<compile_context>
chip_gen: v7x
topology: tpu7x:2x2x1
jax: 0.10.0
libtpu: 0.0.40
codegen_flags: <defaults>
</compile_context>

<pallas_src>
import jax
import jax.numpy as jnp
from jax import lax
from jax.experimental import pallas as pl
from jax.experimental.pallas import tpu as pltpu

VOCAB_SIZE = 128
EMBED_DIM = 32
CONTEXT_SIZE = 4
HIDDEN = 300
HIDDEN_PAD = 384                       # 300 -> next multiple of 128 (zero-padded)
IN_FEATS = CONTEXT_SIZE * EMBED_DIM    # 128


def cbow_kernel(idx_ref, emb_ref, w1_ref, b1_ref, w2_ref, b2_ref, out_ref):
    # idx: (TB, CONTEXT) i32   emb: (VOCAB, EMBED) bf16
    # w1:  (IN_FEATS, HIDDEN_PAD) bf16   b1: (1, HIDDEN_PAD) f32
    # w2:  (HIDDEN_PAD, VOCAB)   bf16    b2: (1, VOCAB) f32
    # out: (TB, VOCAB) f32
    idx = idx_ref[...]                                   # (TB, C) int32
    tb = idx.shape[0]
    emb = emb_ref[...]                                   # (VOCAB, EMBED) bf16
    vocab_iota = lax.broadcasted_iota(jnp.int32, (tb, VOCAB_SIZE), 1)

    # Fused embedding gather + first Linear:
    #   x @ W1 = sum_c emb[idx[:, c]] @ W1[c*E:(c+1)*E, :]
    # The row gather is a one-hot bf16 matmul (robust lowering, runs on the MXU).
    acc = jnp.zeros((tb, HIDDEN_PAD), jnp.float32)
    for c in range(CONTEXT_SIZE):                        # static unroll (4)
        onehot = (idx[:, c:c + 1] == vocab_iota)
        onehot = onehot.astype(jnp.float32).astype(jnp.bfloat16)       # (TB, VOCAB)
        x_c = jnp.dot(onehot, emb, preferred_element_type=jnp.float32)  # (TB, EMBED)
        w1_c = w1_ref[c * EMBED_DIM:(c + 1) * EMBED_DIM, :]             # (EMBED, HP)
        acc = acc + jnp.dot(x_c.astype(jnp.bfloat16), w1_c,
                            preferred_element_type=jnp.float32)

    # ReLU (padded hidden lanes are exactly 0: zero w1 columns + zero b1 pad).
    h = jnp.maximum(acc + b1_ref[...], 0.0)              # (TB, HIDDEN_PAD) f32

    # Second Linear (zero-padded w2 rows contribute nothing).
    logits = jnp.dot(h.astype(jnp.bfloat16), w2_ref[...],
                     preferred_element_type=jnp.float32) + b2_ref[...]

    # Stable log-softmax over the vocab axis.
    m = jnp.max(logits, axis=-1, keepdims=True)
    z = logits - m
    lse = jnp.log(jnp.sum(jnp.exp(z), axis=-1, keepdims=True))
    out_ref[...] = z - lse


def cbow_forward(inp_idx, emb, w1, b1, w2, b2, *, block_b=128):
    """inp_idx: (B, CONTEXT_SIZE) int32 token ids; returns (B, VOCAB) log-probs."""
    B = inp_idx.shape[0]
    block_b = min(block_b, B)
    assert B % block_b == 0, "batch must be a multiple of the batch tile"
    grid = (B // block_b,)

    return pl.pallas_call(
        cbow_kernel,
        out_shape=jax.ShapeDtypeStruct((B, VOCAB_SIZE), jnp.float32),
        grid_spec=pltpu.PrefetchScalarGridSpec(
            num_scalar_prefetch=0,
            grid=grid,
            in_specs=[
                pl.BlockSpec((block_b, CONTEXT_SIZE), lambda i: (i, 0)),   # token ids
                pl.BlockSpec((VOCAB_SIZE, EMBED_DIM), lambda i: (0, 0)),   # embeddings
                pl.BlockSpec((IN_FEATS, HIDDEN_PAD), lambda i: (0, 0)),    # w1 (resident)
                pl.BlockSpec((1, HIDDEN_PAD), lambda i: (0, 0)),           # b1
                pl.BlockSpec((HIDDEN_PAD, VOCAB_SIZE), lambda i: (0, 0)),  # w2 (resident)
                pl.BlockSpec((1, VOCAB_SIZE), lambda i: (0, 0)),           # b2
            ],
            out_specs=pl.BlockSpec((block_b, VOCAB_SIZE), lambda i: (i, 0)),
        ),
        compiler_params=pltpu.CompilerParams(
            dimension_semantics=("parallel",),   # batch tiles are independent -> megacore
        ),
    )(inp_idx, emb, w1, b1, w2, b2)


def init_params(key):
    """PyTorch-like init; hidden dim zero-padded 300 -> 384; weights cast to bf16."""
    k_emb, k_w1, k_b1, k_w2, k_b2 = jax.random.split(key, 5)
    emb = jax.random.normal(k_emb, (VOCAB_SIZE, EMBED_DIM), jnp.float32)

    bound1 = 1.0 / jnp.sqrt(IN_FEATS)
    w1 = jax.random.uniform(k_w1, (IN_FEATS, HIDDEN), jnp.float32, -bound1, bound1)
    b1 = jax.random.uniform(k_b1, (1, HIDDEN), jnp.float32, -bound1, bound1)
    bound2 = 1.0 / jnp.sqrt(HIDDEN)
    w2 = jax.random.uniform(k_w2, (HIDDEN, VOCAB_SIZE), jnp.float32, -bound2, bound2)
    b2 = jax.random.uniform(k_b2, (1, VOCAB_SIZE), jnp.float32, -bound2, bound2)

    # Zero padding (must be zeros so padded hidden units contribute nothing).
    w1p = jnp.zeros((IN_FEATS, HIDDEN_PAD), jnp.float32).at[:, :HIDDEN].set(w1)
    b1p = jnp.zeros((1, HIDDEN_PAD), jnp.float32).at[:, :HIDDEN].set(b1)
    w2p = jnp.zeros((HIDDEN_PAD, VOCAB_SIZE), jnp.float32).at[:HIDDEN, :].set(w2)

    return (emb.astype(jnp.bfloat16),
            w1p.astype(jnp.bfloat16), b1p,
            w2p.astype(jnp.bfloat16), b2)


def cbow_reference(inp_idx, emb, w1, b1, w2, b2):
    """Pure-JAX reference mirroring the kernel's bf16 feed / f32 accumulate."""
    B = inp_idx.shape[0]
    x = jnp.take(emb.astype(jnp.float32), inp_idx.reshape(-1), axis=0)
    x = x.reshape(B, IN_FEATS)
    h = jnp.maximum(x @ w1.astype(jnp.float32) + b1, 0.0)
    h = h.astype(jnp.bfloat16).astype(jnp.float32)
    logits = h @ w2.astype(jnp.float32) + b2
    return jax.nn.log_softmax(logits, axis=-1)


if __name__ == "__main__":
    key = jax.random.PRNGKey(0)
    params = init_params(key)

    # Batch of context windows (each row = the original module's `inp`).
    B = 256
    inp_idx = jax.random.randint(
        jax.random.PRNGKey(1), (B, CONTEXT_SIZE), 0, VOCAB_SIZE, dtype=jnp.int32
    )
    # TODO(synk): PyTorch nn.Embedding raises on out-of-range ids; the one-hot
    # gather silently yields a zero embedding instead.

    fwd = jax.jit(cbow_forward)
    out = jax.block_until_ready(fwd(inp_idx, *params))

    assert out.shape == (B, VOCAB_SIZE)
    # Log-softmax rows should sum to ~1 in prob space.
    probs_sum = jnp.sum(jnp.exp(out), axis=-1)
    assert bool(jnp.all(jnp.abs(probs_sum - 1.0) < 1e-3))
    # Match the pure-JAX reference.
    ref = cbow_reference(inp_idx, *params)
    max_err = float(jnp.max(jnp.abs(out - ref)))
    assert max_err < 1e-2, f"max abs error vs reference: {max_err}"

    print("KERNEL_OK")
</pallas_src>

<mosaic_0001>
module attributes {stable_mosaic.version = 11 : i64} {
  func.func @cbow_kernel(%arg0: i32, %arg1: memref<128x4xi32, #tpu.memory_space<vmem>>, %arg2: memref<128x32xbf16, #tpu.memory_space<vmem>>, %arg3: memref<128x384xbf16, #tpu.memory_space<vmem>>, %arg4: memref<1x384xf32, #tpu.memory_space<vmem>>, %arg5: memref<384x128xbf16, #tpu.memory_space<vmem>>, %arg6: memref<1x128xf32, #tpu.memory_space<vmem>>, %arg7: memref<128x128xf32, #tpu.memory_space<vmem>>) attributes {dimension_semantics = [#tpu.dimension_semantics<parallel>], iteration_bounds = array<i64: 2>, scalar_prefetch = 0 : i64, scratch_operands = 0 : i64, tpu.core_type = #tpu.core_type<tc>, window_params = [{transform_indices = @transform_0, window_bounds = array<i64: 128, 4>}, {pipeline_mode = #tpu.pipeline_mode<synchronous>, transform_indices = @transform_1, window_bounds = array<i64: 128, 32>}, {pipeline_mode = #tpu.pipeline_mode<synchronous>, transform_indices = @transform_2, window_bounds = array<i64: 128, 384>}, {pipeline_mode = #tpu.pipeline_mode<synchronous>, transform_indices = @transform_3, window_bounds = array<i64: 1, 384>}, {pipeline_mode = #tpu.pipeline_mode<synchronous>, transform_indices = @transform_4, window_bounds = array<i64: 384, 128>}, {pipeline_mode = #tpu.pipeline_mode<synchronous>, transform_indices = @transform_5, window_bounds = array<i64: 1, 128>}, {transform_indices = @transform_6, window_bounds = array<i64: 128, 128>}]} {
    %c0 = arith.constant 0 : index
    %c0_0 = arith.constant 0 : index
    %0 = vector.load %arg1[%c0, %c0_0] : memref<128x4xi32, #tpu.memory_space<vmem>>, vector<128x4xi32>
    %c0_1 = arith.constant 0 : index
    %c0_2 = arith.constant 0 : index
    %1 = vector.load %arg2[%c0_1, %c0_2] : memref<128x32xbf16, #tpu.memory_space<vmem>>, vector<128x32xbf16>
    %2 = tpu.iota {dimensions = array<i32: 1>} : vector<128x128xi32>
    %cst = arith.constant 0.000000e+00 : f32
    %3 = vector.broadcast %cst : f32 to vector<128x384xf32>
    %4 = vector.extract_strided_slice %0 {offsets = [0, 0], sizes = [128, 1], strides = [1, 1]} : vector<128x4xi32> to vector<128x1xi32>
    %5 = vector.broadcast %4 : vector<128x1xi32> to vector<128x128xi32>
    %6 = arith.cmpi eq, %5, %2 : vector<128x128xi32>
    %7 = arith.extui %6 : vector<128x128xi1> to vector<128x128xi32>
    %8 = arith.sitofp %7 : vector<128x128xi32> to vector<128x128xf32>
    %9 = arith.truncf %8 : vector<128x128xf32> to vector<128x128xbf16>
    %cst_3 = arith.constant dense<0.000000e+00> : vector<128x32xf32>
    %10 = tpu.matmul %9, %1, %cst_3 {dimension_numbers = #tpu.dot_dimension_numbers<[1], [0], [0], [1], [0, 0, 1, 1], [], []>} : vector<128x128xbf16>, vector<128x32xbf16>, vector<128x32xf32> -> vector<128x32xf32>
    %c0_4 = arith.constant 0 : index
    %c0_5 = arith.constant 0 : index
    %11 = vector.load %arg3[%c0_4, %c0_5] : memref<128x384xbf16, #tpu.memory_space<vmem>>, vector<32x384xbf16>
    %12 = arith.truncf %10 : vector<128x32xf32> to vector<128x32xbf16>
    %cst_6 = arith.constant dense<0.000000e+00> : vector<128x384xf32>
    %13 = tpu.matmul %12, %11, %cst_6 {dimension_numbers = #tpu.dot_dimension_numbers<[1], [0], [0], [1], [0, 0, 1, 1], [], []>} : vector<128x32xbf16>, vector<32x384xbf16>, vector<128x384xf32> -> vector<128x384xf32>
    %14 = arith.addf %3, %13 : vector<128x384xf32>
    %15 = vector.extract_strided_slice %0 {offsets = [0, 1], sizes = [128, 1], strides = [1, 1]} : vector<128x4xi32> to vector<128x1xi32>
    %16 = vector.broadcast %15 : vector<128x1xi32> to vector<128x128xi32>
    %17 = arith.cmpi eq, %16, %2 : vector<128x128xi32>
    %18 = arith.extui %17 : vector<128x128xi1> to vector<128x128xi32>
    %19 = arith.sitofp %18 : vector<128x128xi32> to vector<128x128xf32>
    %20 = arith.truncf %19 : vector<128x128xf32> to vector<128x128xbf16>
    %cst_7 = arith.constant dense<0.000000e+00> : vector<128x32xf32>
    %21 = tpu.matmul %20, %1, %cst_7 {dimension_numbers = #tpu.dot_dimension_numbers<[1], [0], [0], [1], [0, 0, 1, 1], [], []>} : vector<128x128xbf16>, vector<128x32xbf16>, vector<128x32xf32> -> vector<128x32xf32>
    %c32 = arith.constant 32 : index
    %c0_8 = arith.constant 0 : index
    %22 = vector.load %arg3[%c32, %c0_8] : memref<128x384xbf16, #tpu.memory_space<vmem>>, vector<32x384xbf16>
    %23 = arith.truncf %21 : vector<128x32xf32> to vector<128x32xbf16>
    %cst_9 = arith.constant dense<0.000000e+00> : vector<128x384xf32>
    %24 = tpu.matmul %23, %22, %cst_9 {dimension_numbers = #tpu.dot_dimension_numbers<[1], [0], [0], [1], [0, 0, 1, 1], [], []>} : vector<128x32xbf16>, vector<32x384xbf16>, vector<128x384xf32> -> vector<128x384xf32>
    %25 = arith.addf %14, %24 : vector<128x384xf32>
    %26 = vector.extract_strided_slice %0 {offsets = [0, 2], sizes = [128, 1], strides = [1, 1]} : vector<128x4xi32> to vector<128x1xi32>
    %27 = vector.broadcast %26 : vector<128x1xi32> to vector<128x128xi32>
    %28 = arith.cmpi eq, %27, %2 : vector<128x128xi32>
    %29 = arith.extui %28 : vector<128x128xi1> to vector<128x128xi32>
    %30 = arith.sitofp %29 : vector<128x128xi32> to vector<128x128xf32>
    %31 = arith.truncf %30 : vector<128x128xf32> to vector<128x128xbf16>
    %cst_10 = arith.constant dense<0.000000e+00> : vector<128x32xf32>
    %32 = tpu.matmul %31, %1, %cst_10 {dimension_numbers = #tpu.dot_dimension_numbers<[1], [0], [0], [1], [0, 0, 1, 1], [], []>} : vector<128x128xbf16>, vector<128x32xbf16>, vector<128x32xf32> -> vector<128x32xf32>
    %c64 = arith.constant 64 : index
    %c0_11 = arith.constant 0 : index
    %33 = vector.load %arg3[%c64, %c0_11] : memref<128x384xbf16, #tpu.memory_space<vmem>>, vector<32x384xbf16>
    %34 = arith.truncf %32 : vector<128x32xf32> to vector<128x32xbf16>
    %cst_12 = arith.constant dense<0.000000e+00> : vector<128x384xf32>
    %35 = tpu.matmul %34, %33, %cst_12 {dimension_numbers = #tpu.dot_dimension_numbers<[1], [0], [0], [1], [0, 0, 1, 1], [], []>} : vector<128x32xbf16>, vector<32x384xbf16>, vector<128x384xf32> -> vector<128x384xf32>
    %36 = arith.addf %25, %35 : vector<128x384xf32>
    %37 = vector.extract_strided_slice %0 {offsets = [0, 3], sizes = [128, 1], strides = [1, 1]} : vector<128x4xi32> to vector<128x1xi32>
    %38 = vector.broadcast %37 : vector<128x1xi32> to vector<128x128xi32>
    %39 = arith.cmpi eq, %38, %2 : vector<128x128xi32>
    %40 = arith.extui %39 : vector<128x128xi1> to vector<128x128xi32>
    %41 = arith.sitofp %40 : vector<128x128xi32> to vector<128x128xf32>
    %42 = arith.truncf %41 : vector<128x128xf32> to vector<128x128xbf16>
    %cst_13 = arith.constant dense<0.000000e+00> : vector<128x32xf32>
    %43 = tpu.matmul %42, %1, %cst_13 {dimension_numbers = #tpu.dot_dimension_numbers<[1], [0], [0], [1], [0, 0, 1, 1], [], []>} : vector<128x128xbf16>, vector<128x32xbf16>, vector<128x32xf32> -> vector<128x32xf32>
    %c96 = arith.constant 96 : index
    %c0_14 = arith.constant 0 : index
    %44 = vector.load %arg3[%c96, %c0_14] : memref<128x384xbf16, #tpu.memory_space<vmem>>, vector<32x384xbf16>
    %45 = arith.truncf %43 : vector<128x32xf32> to vector<128x32xbf16>
    %cst_15 = arith.constant dense<0.000000e+00> : vector<128x384xf32>
    %46 = tpu.matmul %45, %44, %cst_15 {dimension_numbers = #tpu.dot_dimension_numbers<[1], [0], [0], [1], [0, 0, 1, 1], [], []>} : vector<128x32xbf16>, vector<32x384xbf16>, vector<128x384xf32> -> vector<128x384xf32>
    %47 = arith.addf %36, %46 : vector<128x384xf32>
    %c0_16 = arith.constant 0 : index
    %c0_17 = arith.constant 0 : index
    %48 = vector.load %arg4[%c0_16, %c0_17] : memref<1x384xf32, #tpu.memory_space<vmem>>, vector<1x384xf32>
    %49 = vector.broadcast %48 : vector<1x384xf32> to vector<128x384xf32>
    %50 = arith.addf %47, %49 : vector<128x384xf32>
    %cst_18 = arith.constant 0.000000e+00 : f32
    %51 = vector.broadcast %cst_18 : f32 to vector<128x384xf32>
    %52 = arith.maximumf %50, %51 : vector<128x384xf32>
    %53 = arith.truncf %52 : vector<128x384xf32> to vector<128x384xbf16>
    %c0_19 = arith.constant 0 : index
    %c0_20 = arith.constant 0 : index
    %54 = vector.load %arg5[%c0_19, %c0_20] : memref<384x128xbf16, #tpu.memory_space<vmem>>, vector<384x128xbf16>
    %cst_21 = arith.constant dense<0.000000e+00> : vector<128x128xf32>
    %55 = tpu.matmul %53, %54, %cst_21 {dimension_numbers = #tpu.dot_dimension_numbers<[1], [0], [0], [1], [0, 0, 1, 1], [], []>} : vector<128x384xbf16>, vector<384x128xbf16>, vector<128x128xf32> -> vector<128x128xf32>
    %c0_22 = arith.constant 0 : index
    %c0_23 = arith.constant 0 : index
    %56 = vector.load %arg6[%c0_22, %c0_23] : memref<1x128xf32, #tpu.memory_space<vmem>>, vector<1x128xf32>
    %57 = vector.broadcast %56 : vector<1x128xf32> to vector<128x128xf32>
    %58 = arith.addf %55, %57 : vector<128x128xf32>
    %cst_24 = arith.constant dense<0xFF800000> : vector<128xf32>
    %59 = vector.multi_reduction <maximumf>, %58, %cst_24 [1] : vector<128x128xf32> to vector<128xf32>
    %60 = vector.shape_cast %59 : vector<128xf32> to vector<128x1xf32>
    %61 = vector.broadcast %60 : vector<128x1xf32> to vector<128x128xf32>
    %62 = arith.subf %58, %61 : vector<128x128xf32>
    %63 = math.exp %62 : vector<128x128xf32>
    %cst_25 = arith.constant dense<0.000000e+00> : vector<128xf32>
    %64 = vector.multi_reduction <add>, %63, %cst_25 [1] : vector<128x128xf32> to vector<128xf32>
    %65 = vector.shape_cast %64 : vector<128xf32> to vector<128x1xf32>
    %66 = math.log %65 : vector<128x1xf32>
    %67 = vector.broadcast %66 : vector<128x1xf32> to vector<128x128xf32>
    %68 = arith.subf %62, %67 : vector<128x128xf32>
    %c0_26 = arith.constant 0 : index
    %c0_27 = arith.constant 0 : index
    %69 = vector.load %arg7[%c0_26, %c0_27] : memref<128x128xf32, #tpu.memory_space<vmem>>, vector<128x128xf32>
    tpu.vector_store %arg7[%c0_26, %c0_27], %68 {strides = array<i32>} : memref<128x128xf32, #tpu.memory_space<vmem>>, vector<128x128xf32>,
    return
  }
  func.func @transform_0(%arg0: i32) -> (i32, i32) {
    %c0_i32 = arith.constant 0 : i32
    %c0_i32_0 = arith.constant 0 : i32
    return %arg0, %c0_i32 : i32, i32
  }
  func.func @transform_1(%arg0: i32) -> (i32, i32) {
    %c0_i32 = arith.constant 0 : i32
    %c0_i32_0 = arith.constant 0 : i32
    %c0_i32_1 = arith.constant 0 : i32
    return %c0_i32, %c0_i32_0 : i32, i32
  }
  func.func @transform_2(%arg0: i32) -> (i32, i32) {
    %c0_i32 = arith.constant 0 : i32
    %c0_i32_0 = arith.constant 0 : i32
    %c0_i32_1 = arith.constant 0 : i32
    return %c0_i32, %c0_i32_0 : i32, i32
  }
  func.func @transform_3(%arg0: i32) -> (i32, i32) {
    %c0_i32 = arith.constant 0 : i32
    %c0_i32_0 = arith.constant 0 : i32
    %c0_i32_1 = arith.constant 0 : i32
    return %c0_i32, %c0_i32_0 : i32, i32
  }
  func.func @transform_4(%arg0: i32) -> (i32, i32) {
    %c0_i32 = arith.constant 0 : i32
    %c0_i32_0 = arith.constant 0 : i32
    %c0_i32_1 = arith.constant 0 : i32
    return %c0_i32, %c0_i32_0 : i32, i32
  }
  func.func @transform_5(%arg0: i32) -> (i32, i32) {
    %c0_i32 = arith.constant 0 : i32
    %c0_i32_0 = arith.constant 0 : i32
    %c0_i32_1 = arith.constant 0 : i32
    return %c0_i32, %c0_i32_0 : i32, i32
  }
  func.func @transform_6(%arg0: i32) -> (i32, i32) {
    %c0_i32 = arith.constant 0 : i32
    %c0_i32_0 = arith.constant 0 : i32
    return %arg0, %c0_i32 : i32, i32
  }
}

</mosaic_0001>

<bundles_post_ra>
// kernel: cbow_forward.1
= control target key start
LH: loop header
LB: loop body
LE: loop exit
PB: predicated region body
PF: predicated region fallthrough
CT: control target
= control target key end

     0   :  { %11 = vsyncpa [#allocation3], 0  ;;  %s5258_s0 = inlined_call_operand.vmem [shape: s32[256,4], index: 0, kind: input, shape index: {}]   ;;  %s5259_s1 = inlined_call_operand.vmem [shape: bf16[128,32], index: 1, kind: input, shape index: {}]   ;;  %s5260_s2 = inlined_call_operand.vmem [shape: bf16[128,384], index: 2, kind: input, shape index: {}]   ;;  %s5261_s3 = inlined_call_operand.vmem [shape: f32[1,384], index: 3, kind: input, shape index: {}]   ;;  %s5262_s4 = inlined_call_operand.hbm [shape: bf16[384,128], index: 4, kind: input, shape index: {}]   ;;  %s5263_s5 = inlined_call_operand.vmem [shape: f32[1,128], index: 5, kind: input, shape index: {}]   ;;  %s5264_s6 = inlined_call_operand.hbm [shape: f32[256,128], index: 6, kind: output, shape index: {}]  }
   0x1   :  { %12 = vsyncpa [#allocation4], 0 }
   0x2   :  { %14 = vsyncpa [#allocation4 + $0x1], 0  ;;  %s4353_s21 = smov 0   ;;  %s4355_s22 = smov 0  }
   0x3   :  { %s4357_s23 = smov 0   ;;  %s4359_s24 = smov 0  }
   0x4 LB: > { %s4374_s25 = sadd.s32 4294967295, %s4305_s24   ;;  %s3174_s26 = sadd.s32 4294967294, %s4305_s24   ;;  %s4305_s24 = sphi %s4359_s24, %s5280_s24   ;;  %s4301_s23 = sphi %s4357_s23, %s5279_s23   ;;  %s4297_s22 = sphi %s4355_s22, %s5278_s22   ;;  %s4293_s21 = sphi %s4353_s21, %s5277_s21  }
   0x5   : > { %s4378_s27 = sadd.s32 1, %s4305_s24   ;;  %s158_s28 = sadd.s32 1, %s4301_s23 }
   0x6   : > { %s155_s29 = ssub.s32 %s4305_s24, %s4378_s27  ;;  %p168_p0 = scmp.ne.s32.totalorder %s4301_s23, %s4297_s22 }
   0x7   : > { %p156_p1 = scmp.eq.s32.totalorder %s155_s29, 0  ;;  %p169_p2 = scmp.eq.s32.totalorder %s4374_s25, 1 }
   0x8   : > { %p174_p3 = scmp.ne.s32.totalorder %s4297_s22, %s4293_s21  ;;  %p175_p4 = scmp.eq.s32.totalorder %s3174_s26, 1 }
   0x9   : > { %s4389_s30 = scalar_select %p156_p1, %s4301_s23, %s158_s28  }
   0xa   : > { %p4391_p5 = por %p169_p2, %p168_p0  ;;  %p4395_p6 = por %p175_p4, %p174_p3 }
   0xb   : > { %p3175_p7 = scmp.ge.s32.totalorder %s4305_s24, 1  ;;  %p182_p8 = scmp.lt.s32.totalorder %s4305_s24, 3 }
   0xc   : > { %s5268_s7 = scalar_select %p4391_p5, 1, 0 }
   0xd   : > { %s5269_s8 = scalar_select %p4395_p6, 1, 0 }
   0xe   : > { %p5265_p9 = scmp.eq.s32.totalorder %s4374_s25, 0  ;;  %p4402_p10 = pnand %p3175_p7, %p182_p8 }
   0xf   : > { %s4307_s10 = smov [#allocation2]   ;;  %s4211_s15 = scalar_lea.hbm %s5262_s4, 3072 }
  0x10   : > { %s5270_s9 = scalar_select %p4402_p10, 1, 0 }
  0x11   : > { %s203_s11 = sshll.u32 %s4307_s10, 4  ;;  %p4016_p11 = pneg %p4402_p10  ;;  %s204_s11 = int_to_ptr.vmem [resolvable:$true] %s203_s11 }
  0x12   : > { %p4212_p13 = scmp.ne.s32.totalorder %s5262_s4, %s4211_s15  ;;  %p4218_p3 = scmp.lt.u32.totalorder %s4211_s15, %s5262_s4 }
  0x13   : > { %p4410_p12 = pnand %p5265_p9, %p4016_p11 }
  0x15   : > { %p4213_p0 = pneg %p4410_p12 }
  0x17   : > { %p4214_p1 = pnand %p4213_p0, %p4212_p13 }
  0x19   : > { %p4215_p2 = pneg %p4214_p1 }
  0x1b   : > { %p4220_p4 = pnand %p4218_p3, %p4215_p2 }
  0x1d   : > { %4223 = shalt.err (!%p4220_p4)
}
  0x1e   : > { %s4224_s20 = scalar_lea.vmem %s204_s11, 3072  ;;  %p4232_p9 = scmp.lt.s32.totalorder %s204_s11, %s204_s11 }
  0x1f   : > { %p4225_p7 = scmp.ne.s32.totalorder %s204_s11, %s4224_s20  ;;  %p4233_p6 = scmp.lt.s32.totalorder %s4224_s20, %s4224_s20 }
  0x21   : > { %p4227_p8 = pnand %p4225_p7, %p4213_p0  ;;  %p4234_p5 = por %p4233_p6, %p4232_p9 }
  0x23   : > { %p4228_p11 = pneg %p4227_p8 }
  0x25   : > { %p4235_p10 = pnand %p4234_p5, %p4228_p11 }
  0x27   : > { %4238 = shalt.err (!%p4235_p10)
}
  0x28   : > { %s4308_s26 = smov 64   ;;  %s4309_s28 = smov 4  }
  0x29   : > { %4019 = dma.hbm_to_vmem [thread:$0]  (!%p4410_p12), %s5262_s4, 3072, %s204_s11, [#allocation3], %s4308_s26, %s4308_s26, %s4309_s28  }
  0x2a   : > { %p5272_p13 = scmp.ne.s32.totalorder %s5270_s9, 0 }
  0x2b   : > { %p5273_p1 = scmp.eq.s32.totalorder (!%p5272_p13), %s4374_s25, 0 }
  0x2c   : > { %231 = sbr.rel (%p5272_p13) target bundleno = 1813 (0x715), region = 44 }
  0x33   : > { %4284 = dma.done.wait (%p5273_p1), [#allocation3], 3072   ;;  %p5274_p0 = pmov %p5273_p1 }
  0x34   : > { %s3181_s13 = sshll.u32 %s4374_s25, 4  ;;  %v4310_v0 = vmov 1   ;;  %v4467_v7 = vld [vmem:[%s5259_s1] sm:$0xff]   ;;  %v4472_v8 = vld [vmem:[%s5259_s1 + $0x8] sm:$0xff]   ;;  %v4490_v11 = vld [vmem:[%s5259_s1 + $0x10] sm:$0xff]   ;;  %v4311_v25 = vmov 0   ;;  %v301_v28 = vlaneseq }
  0x35   : > { %4286 = vsyncadd (%p5274_p0), [#allocation3], 4294964224  ;;  %4070 = vset.pattern.permute.xlu1 %v4310_v0  ;;  %4069 = vset.pattern.permute.xlu0 %v4310_v0  ;;  %p262_p5 = scmp.lt.s32.totalorder %s3181_s13, 31  ;;  %v4504_v14 = vld [vmem:[%s5259_s1 + $0x18] sm:$0xff]   ;;  %v4521_v17 = vld [vmem:[%s5259_s1 + $0x20] sm:$0xff]   ;;  %v4312_v27 = vmov 2  }
  0x36   : > { %3654 = vmatprep.subr.bf16.mxu1 %v4467_v7  ;;  %3622 = vmatprep.subr.bf16.mxu0 %v4467_v7  ;;  %v4538_v20 = vld [vmem:[%s5259_s1 + $0x28] sm:$0xff]   ;;  %v4555_v23 = vld [vmem:[%s5259_s1 + $0x30] sm:$0xff]   ;;  %v4567_v24 = vld [vmem:[%s5259_s1 + $0x38] sm:$0xff]   ;;  %v4616_v31 = vand.u32 127, %v301_v28  ;;  %v4313_v34 = vmov 1.0|1.0  }
  0x37   : > { %s5282_s13 = smov (!%p262_p5, %s3181_s13), 31  ;;  %3655 = vmatpush3.bf16.msra.mxu1 %v4467_v7  ;;  %3623 = vmatpush3.bf16.msra.mxu0 %v4467_v7  ;;  %v4087_v26 = vld [vmem:[%s5260_s2 + $0x34] ss:$12 sps:$4 sm:$0xff]   ;;  %v4085_v37 = vld [vmem:[%s5260_s2 + $0x30] ss:$12 sps:$4 sm:$0xff]   ;;  %s258_s20 = sand.u32 1, %s4297_s22  }
  0x38   : > { %s3182_s12 = sshll.u32 %s5282_s13, 3  ;;  %3656 = vmatprep.subr.bf16.mxu1 %v4472_v8  ;;  %3624 = vmatprep.subr.bf16.mxu0 %v4472_v8  ;;  %v4090_v0 = vld [vmem:[%s5260_s2 + $0x4c] ss:$12 sps:$4 sm:$0xff]   ;;  %s3180_s26 = sshll.u32 %s258_s20, 7 }
  0x39   : > { %s4440_s11 = scalar_lea.vmem %s5258_s0, %s3182_s12  ;;  %s5173_s28 = scalar_lea.vmem [#allocation5], %s3180_s26 }
  0x3a   : > { %v4443_v1 = vld [vmem:[%s4440_s11 + $0x10] sm:$0xff]  ;;  %v4446_v2 = vld [vmem:[%s4440_s11] sm:$0xff]  ;;  %v4451_v3 = vld [vmem:[%s4440_s11 + $0x18] sm:$0xff]  ;;  %s3437_s29 = sshll.u32 %s4374_s25, 11  ;;  %s3100_s10 = sshll.u32 %s5173_s28, 4  ;;  %s5210_s10 = int_to_ptr.vmem [resolvable:$true] %s3100_s10 }
  0x3b   : > { %575 = vperm.xlu1 %4070, %v4443_v1   ;;  %569 = vperm.xlu0 %4069, %v4446_v2   ;;  %v4454_v4 = vld [vmem:[%s4440_s11 + $0x8] sm:$0xff]  ;;  %v4462_v6 = vld [vmem:[%s4440_s11 + $0x20] sm:$0xff]  ;;  %v4479_v9 = vld [vmem:[%s4440_s11 + $0x38] sm:$0xff]  ;;  %s5208_s14 = scalar_lea.hbm %s5264_s6, %s3437_s29  ;;  %s5217_s25 = scalar_lea.sflag [#allocation4], %s258_s20 }
  0x3c   : > { %v4457_v5 = vld [vmem:[%s4440_s11 + $0x28] sm:$0xff]  ;;  %v4482_v10 = vld [vmem:[%s4440_s11 + $0x30] sm:$0xff]  ;;  %v4497_v13 = vld [vmem:[%s4440_s11 + $0x40] sm:$0xff]  ;;  %3657 = vmatpush3.bf16.msra.mxu1 %v4472_v8  ;;  %3625 = vmatpush3.bf16.msra.mxu0 %v4472_v8  ;;  %s4239_s15 = scalar_lea.vmem %s5210_s10, 2048  ;;  %p5275_p9 = scmp.ne.s32.totalorder %s5268_s7, 0 }
  0x3d   : > { %v4494_v12 = vld [vmem:[%s4440_s11 + $0x48] sm:$0xff]  ;;  %3658 = vmatprep.subr.bf16.mxu1 %v4490_v11  ;;  %3626 = vmatprep.subr.bf16.mxu0 %v4490_v11  ;;  %v4511_v15 = vld [vmem:[%s4440_s11 + $0x58] sm:$0xff]  ;;  %v4514_v16 = vld [vmem:[%s4440_s11 + $0x50] sm:$0xff]  ;;  %p4240_p6 = scmp.ne.s32.totalorder %s5210_s10, %s4239_s15 }
  0x3e   : > { %v4528_v18 = vld [vmem:[%s4440_s11 + $0x68] sm:$0xff]  ;;  %v4531_v19 = vld [vmem:[%s4440_s11 + $0x60] sm:$0xff]  ;;  %v4545_v21 = vld [vmem:[%s4440_s11 + $0x78] sm:$0xff] }
  0x3f   : > { %578 = vperm.xlu1 %4070, %v4451_v3   ;;  %572 = vperm.xlu0 %4069, %v4454_v4   ;;  %v4548_v22 = vld [vmem:[%s4440_s11 + $0x70] sm:$0xff]  ;;  %p4241_p10 = pnand %p4240_p6, %p5275_p9  ;;  %s4315_s11 = smov [#allocation5]  }
  0x40   : > { %3659 = vmatpush3.bf16.msra.mxu1 %v4490_v11  ;;  %3627 = vmatpush3.bf16.msra.mxu0 %v4490_v11  ;;  %s4243_s9 = sshll.u32 %s4315_s11, 4  ;;  %s4244_s9 = int_to_ptr.vmem [resolvable:$false] %s4243_s9 }
  0x41   : > { %3660 = vmatprep.subr.bf16.mxu1 %v4504_v14  ;;  %3628 = vmatprep.subr.bf16.mxu0 %v4504_v14  ;;  %p4242_p12 = pneg %p4241_p10  ;;  %s4245_s16 = scalar_lea.vmem %s4244_s9, 4096 }
  0x42   : > { %p4246_p2 = scmp.lt.s32.totalorder %s5210_s10, %s4244_s9  ;;  %p4247_p3 = scmp.lt.s32.totalorder %s4245_s16, %s4239_s15 }
  0x43   : > { %584 = vperm.xlu1 %4070, %v4457_v5   ;;  %581 = vperm.xlu0 %4069, %v4462_v6  }
  0x44   : > { %3661 = vmatpush3.bf16.msra.mxu1 %v4504_v14  ;;  %3629 = vmatpush3.bf16.msra.mxu0 %v4504_v14  ;;  %p4248_p4 = por %p4247_p3, %p4246_p2 }
  0x45   : > { %3662 = vmatprep.subr.bf16.mxu1 %v4521_v17  ;;  %3630 = vmatprep.subr.bf16.mxu0 %v4521_v17 }
  0x46   : > { %p4249_p7 = pnand %p4248_p4, %p4242_p12 }
  0x47   : > { %590 = vperm.xlu1 %4070, %v4479_v9   ;;  %587 = vperm.xlu0 %4069, %v4482_v10  }
  0x48   : > { %3663 = vmatpush3.bf16.msra.mxu1 %v4521_v17  ;;  %3631 = vmatpush3.bf16.msra.mxu0 %v4521_v17 }
  0x49   : > { %3664 = vmatprep.subr.bf16.mxu1 %v4538_v20  ;;  %3632 = vmatprep.subr.bf16.mxu0 %v4538_v20 }
  0x4b   : > { %596 = vperm.xlu1 %4070, %v4494_v12   ;;  %593 = vperm.xlu0 %4069, %v4497_v13  }
  0x4c   : > { %3665 = vmatpush3.bf16.msra.mxu1 %v4538_v20  ;;  %3633 = vmatpush3.bf16.msra.mxu0 %v4538_v20 }
  0x4d   : > { %3666 = vmatprep.subr.bf16.mxu1 %v4555_v23  ;;  %3634 = vmatprep.subr.bf16.mxu0 %v4555_v23 }
  0x4f   : > { %602 = vperm.xlu1 %4070, %v4511_v15   ;;  %599 = vperm.xlu0 %4069, %v4514_v16  }
  0x50   : > { %3667 = vmatpush3.bf16.msra.mxu1 %v4555_v23  ;;  %3635 = vmatpush3.bf16.msra.mxu0 %v4555_v23 }
  0x51   : > { %3668 = vmatprep.subr.bf16.mxu1 %v4567_v24  ;;  %3636 = vmatprep.subr.bf16.mxu0 %v4567_v24 }
  0x53   : > { %608 = vperm.xlu1 %4070, %v4528_v18   ;;  %605 = vperm.xlu0 %4069, %v4531_v19  }
  0x54   : > { %3669 = vmatpush3.bf16.msra.mxu1 %v4567_v24  ;;  %3637 = vmatpush3.bf16.msra.mxu0 %v4567_v24 }
  0x55   : > { %3862 = vmatprep.subr.bf16.mxu1 %v4087_v26  ;;  %842 = vmatprep.subr.bf16.mxu0 %v4087_v26  ;;  %v4088_v26 = vld [vmem:[%s5260_s2 + $0x48] ss:$12 sps:$4 sm:$0xff]  }
  0x57   : > { %614 = vperm.xlu1 %4070, %v4545_v21   ;;  %611 = vperm.xlu0 %4069, %v4548_v22  }
  0x5b   : > { %4072 = vset.pattern.permute.xlu1 %v4311_v25  ;;  %4071 = vset.pattern.permute.xlu0 %v4311_v25 }
  0x5c   : > { %307 = vperm.xlu1 %4072, %v4454_v4   ;;  %304 = vperm.xlu0 %4071, %v4446_v2  }
  0x60   : > { %310 = vperm.xlu1 %4072, %v4443_v1   ;;  %313 = vperm.xlu0 %4071, %v4451_v3  }
  0x64   : > { %316 = vperm.xlu1 %4072, %v4462_v6   ;;  %319 = vperm.xlu0 %4071, %v4457_v5  }
  0x68   : > { %322 = vperm.xlu1 %4072, %v4482_v10   ;;  %325 = vperm.xlu0 %4071, %v4479_v9  }
  0x6c   : > { %328 = vperm.xlu1 %4072, %v4497_v13   ;;  %331 = vperm.xlu0 %4071, %v4494_v12  }
  0x70   : > { %334 = vperm.xlu1 %4072, %v4514_v16   ;;  %337 = vperm.xlu0 %4071, %v4511_v15  }
  0x74   : > { %340 = vperm.xlu1 %4072, %v4531_v19   ;;  %343 = vperm.xlu0 %4071, %v4528_v18  }
  0x78   : > { %346 = vperm.xlu1 %4072, %v4548_v22   ;;  %349 = vperm.xlu0 %4071, %v4545_v21  }
  0x7c   : > { %4073 = vset.pattern.permute.xlu1 %v4312_v27  ;;  %4074 = vset.pattern.permute.xlu0 %v4312_v27  ;;  %v4091_v27 = vld [vmem:[%s5260_s2 + $0x38] ss:$12 sps:$4 sm:$0xff]  }
  0x7d   : > { %1319 = vperm.xlu1 %4073, %v4446_v2   ;;  %1322 = vperm.xlu0 %4074, %v4454_v4  }
  0x81   : > { %1325 = vperm.xlu1 %4073, %v4443_v1   ;;  %1331 = vperm.xlu0 %4074, %v4462_v6  }
  0x85   : > { %1328 = vperm.xlu1 %4073, %v4451_v3   ;;  %1337 = vperm.xlu0 %4074, %v4482_v10  }
  0x89   : > { %1334 = vperm.xlu1 %4073, %v4457_v5   ;;  %1343 = vperm.xlu0 %4074, %v4497_v13  }
  0x8d   : > { %1340 = vperm.xlu1 %4073, %v4479_v9   ;;  %1349 = vperm.xlu0 %4074, %v4514_v16  }
  0x91   : > { %1346 = vperm.xlu1 %4073, %v4494_v12   ;;  %1355 = vperm.xlu0 %4074, %v4531_v19  }
  0x95   : > { %1352 = vperm.xlu1 %4073, %v4511_v15   ;;  %1361 = vperm.xlu0 %4074, %v4548_v22  }
  0x99   : > { %1358 = vperm.xlu1 %4073, %v4528_v18  }
  0x9d   : > { %1364 = vperm.xlu1 %4073, %v4545_v21  }
  0xba   : > { %v576_v29 = vpop.permute.xlu1 %575  ;;  %v570_v30 = vpop.permute.xlu0 %569 }
  0xbb   : > { %vm618_vm0 = vcmp.eq.s32.totalorder %v576_v29, %v4616_v31  ;;  %vm616_vm3 = vcmp.eq.s32.totalorder %v570_v30, %v4616_v31  ;;  %v4096_v29 = vld [vmem:[%s5260_s2 + $0x4] ss:$12 sps:$4 sm:$0xff]  }
  0xbe   : > { %v579_v32 = vpop.permute.xlu1 %578  ;;  %v573_v33 = vpop.permute.xlu0 %572 }
  0xbf   : > { %vm619_vm1 = vcmp.eq.s32.totalorder %v579_v32, %v4616_v31  ;;  %vm617_vm2 = vcmp.eq.s32.totalorder %v573_v33, %v4616_v31 }
  0xc0   : > { %vm3241_vm4 = vmpackc.low %vm619_vm1, %vm618_vm0 }
  0xc1   : > { %vm3239_vm5 = vmpackc.low %vm617_vm2, %vm616_vm3 }
  0xc2   : > { %3670 = vmatprep.mubr.msk.bf16.mxu1 %vm3239_vm5, %v4313_v34  ;;  %v585_v35 = vpop.permute.xlu1 %584  ;;  %v582_v36 = vpop.permute.xlu0 %581 }
  0xc3   : > { %vm621_vm6 = vcmp.eq.s32.totalorder %v585_v35, %v4616_v31  ;;  %3671 = vmatmul.mubr.msk.bf16.vlgmr.msra.gmra.mrb[0].mxu1 %vm3241_vm4, %v4313_v34  ;;  %vm620_vm7 = vcmp.eq.s32.totalorder %v582_v36, %v4616_v31 }
  0xc4   : > { %vm3243_vm8 = vmpackc.low %vm621_vm6, %vm620_vm7  ;;  %3864 = vmatpush1.bf16.msra.mxu1 %v4085_v37 }
  0xc5   : > { %3674 = vmatprep.mubr.msk.bf16.mxu1 %vm3243_vm8, %v4313_v34  ;;  %3863 = vmatprep.subr.bf16.mxu1 %v4090_v0 }
  0xc6   : > { %v591_v38 = vpop.permute.xlu1 %590  ;;  %v588_v39 = vpop.permute.xlu0 %587 }
  0xc7   : > { %vm623_vm9 = vcmp.eq.s32.totalorder %v591_v38, %v4616_v31  ;;  %vm622_vm10 = vcmp.eq.s32.totalorder %v588_v39, %v4616_v31  ;;  %v4099_v39 = vld [vmem:[%s5260_s2 + $0x1c] ss:$12 sps:$4 sm:$0xff]  }
  0xc8   : > { %vm3245_vm11 = vmpackc.low %vm623_vm9, %vm622_vm10  ;;  %3865 = vmatpush1.bf16.msra.mxu1 %v4088_v26 }
  0xc9   : > { %3686 = vmatprep.subr.bf16.mxu1 %v4091_v27 }
  0xca   : > { %v597_v40 = vpop.permute.xlu1 %596  ;;  %v594_v41 = vpop.permute.xlu0 %593 }
  0xcb   : > { %vm625_vm12 = vcmp.eq.s32.totalorder %v597_v40, %v4616_v31  ;;  %3675 = vmatmul.mubr.msk.bf16.gmra.mrb[4].mxu1 %vm3245_vm11, %v4313_v34  ;;  %vm624_vm13 = vcmp.eq.s32.totalorder %v594_v41, %v4616_v31  ;;  %v4097_v40 = vld [vmem:[%s5260_s2 + $0x18] ss:$12 sps:$4 sm:$0xff]  }
  0xcc   : > { %vm3247_vm14 = vmpackc.low %vm625_vm12, %vm624_vm13 }
  0xcd   : > { %3678 = vmatprep.mubr.msk.bf16.mxu1 %vm3247_vm14, %v4313_v34 }
  0xce   : > { %v603_v42 = vpop.permute.xlu1 %602  ;;  %v600_v43 = vpop.permute.xlu0 %599 }
  0xcf   : > { %vm627_vm15 = vcmp.eq.s32.totalorder %v603_v42, %v4616_v31  ;;  %vm626_vm0 = vcmp.eq.s32.totalorder %v600_v43, %v4616_v31  ;;  %v4314_v42 = vmov 3  }
  0xd0   : > { %vm3249_vm1 = vmpackc.low %vm627_vm15, %vm626_vm0  ;;  %4076 = vset.pattern.permute.xlu1 %v4314_v42  ;;  %4075 = vset.pattern.permute.xlu0 %v4314_v42 }
  0xd1   : > { %1853 = vperm.xlu1 %4076, %v4454_v4   ;;  %1850 = vperm.xlu0 %4075, %v4446_v2  }
  0xd2   : > { %v609_v44 = vpop.permute.xlu1 %608  ;;  %v606_v45 = vpop.permute.xlu0 %605 }
  0xd3   : > { %vm629_vm2 = vcmp.eq.s32.totalorder %v609_v44, %v4616_v31  ;;  %3679 = vmatmul.mubr.msk.bf16.gmra.mrb[8].mxu1 %vm3249_vm1, %v4313_v34  ;;  %vm628_vm3 = vcmp.eq.s32.totalorder %v606_v45, %v4616_v31 }
  0xd4   : > { %vm3251_vm4 = vmpackc.low %vm629_vm2, %vm628_vm3 }
  0xd5   : > { %3682 = vmatprep.mubr.msk.bf16.mxu1 %vm3251_vm4, %v4313_v34  ;;  %1856 = vperm.xlu1 %4076, %v4443_v1  }
  0xd6   : > { %v615_v46 = vpop.permute.xlu1 %614  ;;  %v612_v47 = vpop.permute.xlu0 %611  ;;  %1859 = vperm.xlu0 %4075, %v4451_v3  }
  0xd7   : > { %vm631_vm5 = vcmp.eq.s32.totalorder %v615_v46, %v4616_v31  ;;  %vm630_vm6 = vcmp.eq.s32.totalorder %v612_v47, %v4616_v31 }
  0xd8   : > { %vm3253_vm7 = vmpackc.low %vm631_vm5, %vm630_vm6 }
  0xd9   : > { %1862 = vperm.xlu1 %4076, %v4462_v6  }
  0xda   : > { %1865 = vperm.xlu0 %4075, %v4457_v5  }
  0xdb   : > { %3683 = vmatmul.mubr.msk.bf16.gmra.mrb[12].mxu1 %vm3253_vm7, %v4313_v34  ;;  %v308_v48 = vpop.permute.xlu1 %307  ;;  %v305_v49 = vpop.permute.xlu0 %304 }
  0xdc   : > { %vm352_vm8 = vcmp.eq.s32.totalorder %v308_v48, %v4616_v31  ;;  %vm351_vm9 = vcmp.eq.s32.totalorder %v305_v49, %v4616_v31  ;;  %934 = vmatprep.mubr.bf16.mxu1 %v4311_v25 }
  0xdd   : > { %vm3207_vm10 = vmpackc.low %vm352_vm8, %vm351_vm9  ;;  %1868 = vperm.xlu1 %4076, %v4482_v10   ;;  %v4092_v10 = vld [vmem:[%s5260_s2 + $0x50] ss:$12 sps:$4 sm:$0xff]  }
  0xde   : > { %3638 = vmatprep.mubr.msk.bf16.mxu0 %vm3207_vm10, %v4313_v34  ;;  %1871 = vperm.xlu0 %4075, %v4479_v9  }
  0xdf   : > { %v311_v50 = vpop.permute.xlu1 %310  ;;  %v314_v51 = vpop.permute.xlu0 %313 }
  0xe0   : > { %vm353_vm11 = vcmp.eq.s32.totalorder %v311_v50, %v4616_v31  ;;  %vm354_vm12 = vcmp.eq.s32.totalorder %v314_v51, %v4616_v31 }
  0xe1   : > { %vm3209_vm13 = vmpackc.low %vm354_vm12, %vm353_vm11  ;;  %1874 = vperm.xlu1 %4076, %v4497_v13  }
  0xe2   : > { %3639 = vmatmul.mubr.msk.bf16.vlgmr.msra.gmra.mrb[0].mxu0 %vm3209_vm13, %v4313_v34  ;;  %1877 = vperm.xlu0 %4075, %v4494_v12   ;;  %v4093_v12 = vld [vmem:[%s5260_s2 + $0x8] ss:$12 sps:$4 sm:$0xff]  }
  0xe3   : > { %v317_v52 = vpop.permute.xlu1 %316  ;;  %v320_v53 = vpop.permute.xlu0 %319  ;;  %843 = vmatpush1.bf16.msra.mxu0 %v4085_v37  ;;  %v4094_v37 = vld [vmem:[%s5260_s2] ss:$12 sps:$4 sm:$0xff]  }
  0xe4   : > { %vm355_vm14 = vcmp.eq.s32.totalorder %v317_v52, %v4616_v31  ;;  %vm356_vm15 = vcmp.eq.s32.totalorder %v320_v53, %v4616_v31  ;;  %844 = vmatprep.subr.bf16.mxu0 %v4090_v0 }
  0xe5   : > { %vm3211_vm0 = vmpackc.low %vm356_vm15, %vm355_vm14  ;;  %1880 = vperm.xlu1 %4076, %v4514_v16  }
  0xe6   : > { %3642 = vmatprep.mubr.msk.bf16.mxu0 %vm3211_vm0, %v4313_v34  ;;  %vm817_vm0 = vcmask 261120   ;;  %1883 = vperm.xlu0 %4075, %v4511_v15  }
  0xe7   : > { %v323_v54 = vpop.permute.xlu1 %322  ;;  %v326_v55 = vpop.permute.xlu0 %325  ;;  %845 = vmatpush1.bf16.msra.mxu0 %v4088_v26 }
  0xe8   : > { %vm357_vm1 = vcmp.eq.s32.totalorder %v323_v54, %v4616_v31  ;;  %vm358_vm2 = vcmp.eq.s32.totalorder %v326_v55, %v4616_v31  ;;  %1108 = vmatprep.subr.bf16.mxu0 %v4096_v29 }
  0xe9   : > { %vm3213_vm3 = vmpackc.low %vm358_vm2, %vm357_vm1  ;;  %1886 = vperm.xlu1 %4076, %v4531_v19  }
  0xea   : > { %3643 = vmatmul.mubr.msk.bf16.gmra.mrb[4].mxu0 %vm3213_vm3, %v4313_v34  ;;  %1889 = vperm.xlu0 %4075, %v4528_v18  }
  0xeb   : > { %v329_v56 = vpop.permute.xlu1 %328  ;;  %v332_v57 = vpop.permute.xlu0 %331 }
  0xec   : > { %vm359_vm4 = vcmp.eq.s32.totalorder %v329_v56, %v4616_v31  ;;  %vm360_vm5 = vcmp.eq.s32.totalorder %v332_v57, %v4616_v31 }
  0xed   : > { %vm3215_vm6 = vmpackc.low %vm360_vm5, %vm359_vm4  ;;  %1892 = vperm.xlu1 %4076, %v4548_v22   ;;  %v4100_v22 = vld [vmem:[%s5260_s2 + $0x20] ss:$12 sps:$4 sm:$0xff]  }
  0xee   : > { %3646 = vmatprep.mubr.msk.bf16.mxu0 %vm3215_vm6, %v4313_v34  ;;  %1895 = vperm.xlu0 %4075, %v4545_v21  }
  0xef   : > { %v335_v58 = vpop.permute.xlu1 %334  ;;  %v338_v59 = vpop.permute.xlu0 %337 }
  0xf0   : > { %vm361_vm7 = vcmp.eq.s32.totalorder %v335_v58, %v4616_v31  ;;  %vm362_vm8 = vcmp.eq.s32.totalorder %v338_v59, %v4616_v31 }
  0xf1   : > { %vm3217_vm9 = vmpackc.low %vm362_vm8, %vm361_vm7 }
  0xf2   : > { %3647 = vmatmul.mubr.msk.bf16.gmra.mrb[8].mxu0 %vm3217_vm9, %v4313_v34 }
  0xf3   : > { %v341_v60 = vpop.permute.xlu1 %340  ;;  %v344_v61 = vpop.permute.xlu0 %343 }
  0xf4   : > { %vm363_vm10 = vcmp.eq.s32.totalorder %v341_v60, %v4616_v31  ;;  %vm364_vm11 = vcmp.eq.s32.totalorder %v344_v61, %v4616_v31 }
  0xf5   : > { %vm3219_vm12 = vmpackc.low %vm364_vm11, %vm363_vm10 }
  0xf6   : > { %3650 = vmatprep.mubr.msk.bf16.mxu0 %vm3219_vm12, %v4313_v34 }
  0xf7   : > { %v347_v62 = vpop.permute.xlu1 %346  ;;  %v350_v63 = vpop.permute.xlu0 %349 }
  0xf8   : > { %vm365_vm13 = vcmp.eq.s32.totalorder %v347_v62, %v4616_v31  ;;  %vm366_vm14 = vcmp.eq.s32.totalorder %v350_v63, %v4616_v31 }
  0xf9   : > { %vm3221_vm15 = vmpackc.low %vm366_vm14, %vm365_vm13 }
  0xfa   : > { %3651 = vmatmul.mubr.msk.bf16.gmra.mrb[12].mxu0 %vm3221_vm15, %v4313_v34 }
  0xfb   : > { %874 = vmatprep.mubr.bf16.mxu0 %v4311_v25 }
 0x196   : > { %v3672_v30 = vpop.f32.mrb[0].mxu1 }
 0x197   : > { %v706_v32 = vpop.f32.mrb[1].mxu1 }
 0x198   : > { %v3673_v33 = vpop.f32.mrb[2].mxu1 }
 0x199   : > { %v4683_v35 = vpack.c.bf16 %v3673_v33, %v3672_v30  ;;  %v709_v36 = vpop.f32.mrb[3].mxu1 }
 0x19a   : > { %v4688_v38 = vpack.c.bf16 %v709_v36, %v706_v32 }
 0x19c   : > { %3261 = vmatmul.mubr.msk.bf16.vlgmr.msra.gmra.mrb[16].mxu0 %vm817_vm0, %v4688_v38 }
 0x19d   : > { %884 = vmatprep.mubr.bf16.mxu0 %v4311_v25  ;;  %1109 = vmatpush1.bf16.msra.mxu0 %v4094_v37  ;;  %v1323_v37 = vpop.permute.xlu0 %1322 }
 0x19e   : > { %v3676_v41 = vpop.f32.mrb[4].mxu1  ;;  %1110 = vmatprep.subr.bf16.mxu0 %v4099_v39  ;;  %vm1367_vm2 = vcmp.eq.s32.totalorder %v1323_v37, %v4616_v31  ;;  %v4209_v37 = vld [vmem:[%s5259_s1 + $0x20] sm:$0xff]  }
 0x19f   : > { %v722_v43 = vpop.f32.mrb[5].mxu1 }
 0x1a0   : > { %v3677_v44 = vpop.f32.mrb[6].mxu1 }
 0x1a1   : > { %v4701_v45 = vpack.c.bf16 %v3677_v44, %v3676_v41  ;;  %v725_v46 = vpop.f32.mrb[7].mxu1  ;;  %1111 = vmatpush1.bf16.msra.mxu0 %v4097_v40  ;;  %v4101_v44 = vld [vmem:[%s5260_s2 + $0x68] ss:$12 sps:$4 sm:$0xff]  }
 0x1a2   : > { %v779_v47 = vpack.c.bf16 %v725_v46, %v722_v43  ;;  %v4103_v46 = vld [vmem:[%s5260_s2 + $0x60] ss:$12 sps:$4 sm:$0xff]  }
 0x1a4   : > { %3262 = vmatmul.mubr.msk.bf16.gmra.mrb[20].mxu0 %vm817_vm0, %v4683_v35 }
 0x1a5   : > { %894 = vmatprep.mubr.bf16.mxu0 %v4311_v25 }
 0x1a6   : > { %v3680_v48 = vpop.f32.mrb[8].mxu1 }
 0x1a7   : > { %v738_v49 = vpop.f32.mrb[9].mxu1 }
 0x1a8   : > { %v3681_v4 = vpop.f32.mrb[10].mxu1 }
 0x1a9   : > { %v4710_v2 = vpack.c.bf16 %v3681_v4, %v3680_v48  ;;  %v741_v50 = vpop.f32.mrb[11].mxu1  ;;  %v4205_v4 = vld [vmem:[%s5259_s1] sm:$0xff]  }
 0x1aa   : > { %v781_v51 = vpack.c.bf16 %v741_v50, %v738_v49  ;;  %v4106_v50 = vld [vmem:[%s5260_s2 + $0x78] ss:$12 sps:$4 sm:$0xff]  }
 0x1ac   : > { %3263 = vmatmul.mubr.msk.bf16.gmra.mrb[24].mxu0 %vm817_vm0, %v779_v47 }
 0x1ad   : > { %904 = vmatprep.mubr.bf16.mxu0 %v4311_v25 }
 0x1ae   : > { %v3684_v1 = vpop.f32.mrb[12].mxu1 }
 0x1af   : > { %v754_v3 = vpop.f32.mrb[13].mxu1 }
 0x1b0   : > { %v3685_v6 = vpop.f32.mrb[14].mxu1 }
 0x1b1   : > { %v4718_v5 = vpack.c.bf16 %v3685_v6, %v3684_v1  ;;  %v757_v52 = vpop.f32.mrb[15].mxu1 }
 0x1b2   : > { %v783_v53 = vpack.c.bf16 %v757_v52, %v754_v3 }
 0x1b4   : > { %3264 = vmatmul.mubr.msk.bf16.gmra.mrb[28].mxu0 %vm817_vm0, %v4701_v45  ;;  %3267 = vmatmul.mubr.msk.bf16.vlgmr.msra.gmra.mrb[16].mxu1 %vm817_vm0, %v783_v53 }
 0x1b5   : > { %3687 = vmatpush3.bf16.msra.mxu1 %v4091_v27  ;;  %914 = vmatprep.mubr.bf16.mxu0 %v4311_v25  ;;  %v3640_v9 = vpop.f32.mrb[0].mxu0 }
 0x1b6   : > { %944 = vmatprep.mubr.bf16.mxu1 %v4311_v25  ;;  %3688 = vmatprep.subr.bf16.mxu1 %v4092_v10  ;;  %v489_v13 = vpop.f32.mrb[1].mxu0 }
 0x1b7   : > { %v3641_v54 = vpop.f32.mrb[2].mxu0 }
 0x1b8   : > { %v561_v16 = vpack.c.bf16 %v3641_v54, %v3640_v9  ;;  %v492_v55 = vpop.f32.mrb[3].mxu0  ;;  %v4111_v9 = vld [vmem:[%s5260_s2 + $0x94] ss:$12 sps:$4 sm:$0xff]  }
 0x1b9   : > { %3689 = vmatpush3.bf16.msra.mxu1 %v4092_v10  ;;  %v560_v56 = vpack.c.bf16 %v492_v55, %v489_v13 }
 0x1ba   : > { %3706 = vmatprep.subr.bf16.mxu1 %v4093_v12 }
 0x1bc   : > { %3265 = vmatmul.mubr.msk.bf16.gmra.mrb[32].mxu0 %vm817_vm0, %v781_v51  ;;  %3268 = vmatmul.mubr.msk.bf16.gmra.mrb[20].mxu1 %vm817_vm0, %v4718_v5 }
 0x1bd   : > { %3690 = vmatprep.mubr.msk.bf16.mxu1 %vm817_vm0, %v4688_v38  ;;  %924 = vmatprep.mubr.bf16.mxu0 %v4311_v25  ;;  %v3644_v15 = vpop.f32.mrb[4].mxu0 }
 0x1be   : > { %v505_v19 = vpop.f32.mrb[5].mxu0 }
 0x1bf   : > { %v3645_v57 = vpop.f32.mrb[6].mxu0 }
 0x1c0   : > { %v563_v58 = vpack.c.bf16 %v3645_v57, %v3644_v15  ;;  %v508_v59 = vpop.f32.mrb[7].mxu0  ;;  %v4109_v15 = vld [vmem:[%s5260_s2 + $0x90] ss:$12 sps:$4 sm:$0xff]  }
 0x1c1   : > { %v562_v18 = vpack.c.bf16 %v508_v59, %v505_v19  ;;  %v4114_v19 = vld [vmem:[%s5260_s2 + $0xac] ss:$12 sps:$4 sm:$0xff]  }
 0x1c4   : > { %3266 = vmatmul.mubr.msk.bf16.gmra.mrb[36].mxu0 %vm817_vm0, %v4710_v2  ;;  %3691 = vmatmul.mubr.msk.bf16.vlgmr.msra.gmra.mrb[24].mxu1 %vm817_vm0, %v4683_v35  ;;  %v1320_v35 = vpop.permute.xlu1 %1319 }
 0x1c5   : > { %3707 = vmatpush3.bf16.msra.mxu1 %v4093_v12  ;;  %3694 = vmatprep.mubr.msk.bf16.mxu1 %vm817_vm0, %v779_v47  ;;  %v3648_v60 = vpop.f32.mrb[8].mxu0  ;;  %vm1366_vm1 = vcmp.eq.s32.totalorder %v1320_v35, %v4616_v31  ;;  %v4105_v47 = vld [vmem:[%s5260_s2 + $0x64] ss:$12 sps:$4 sm:$0xff]  }
 0x1c6   : > { %1140 = vmatprep.mubr.bf16.mxu0 %v4311_v25  ;;  %v521_v21 = vpop.f32.mrb[9].mxu0  ;;  %3708 = vmatprep.subr.bf16.mxu1 %v4100_v22  ;;  %vm3315_vm3 = vmpackc.low %vm1367_vm2, %vm1366_vm1 }
 0x1c7   : > { %v3649_v61 = vpop.f32.mrb[10].mxu0  ;;  %1591 = vmatprep.subr.bf16.mxu0 %v4105_v47 }
 0x1c8   : > { %v565_v62 = vpack.c.bf16 %v3649_v61, %v3648_v60  ;;  %v524_v63 = vpop.f32.mrb[11].mxu0  ;;  %v1326_v36 = vpop.permute.xlu1 %1325 }
 0x1c9   : > { %3709 = vmatpush3.bf16.msra.mxu1 %v4100_v22  ;;  %v564_v0 = vpack.c.bf16 %v524_v63, %v521_v21  ;;  %vm1368_vm4 = vcmp.eq.s32.totalorder %v1326_v36, %v4616_v31  ;;  %v4207_v63 = vld [vmem:[%s5259_s1 + $0x10] sm:$0xff]  }
 0x1ca   : > { %3726 = vmatprep.subr.bf16.mxu1 %v4467_v7 }
 0x1cc   : > { %3695 = vmatmul.mubr.msk.bf16.gmra.mrb[28].mxu1 %vm817_vm0, %v4701_v45  ;;  %3283 = vmatmul.mubr.msk.bf16.vlgmr.msra.gmra.mrb[16].mxu0 %vm817_vm0, %v560_v56  ;;  %v4102_v45 = vld [vmem:[%s5260_s2 + $0x80] ss:$12 sps:$4 sm:$0xff]  }
 0x1cd   : > { %3698 = vmatprep.mubr.msk.bf16.mxu1 %vm817_vm0, %v781_v51  ;;  %1150 = vmatprep.mubr.bf16.mxu0 %v4311_v25  ;;  %v3652_v26 = vpop.f32.mrb[12].mxu0 }
 0x1ce   : > { %v537_v27 = vpop.f32.mrb[13].mxu0  ;;  %1592 = vmatpush1.bf16.msra.mxu0 %v4103_v46 }
 0x1cf   : > { %v3653_v29 = vpop.f32.mrb[14].mxu0 }
 0x1d0   : > { %v567_v30 = vpack.c.bf16 %v3653_v29, %v3652_v26  ;;  %v540_v32 = vpop.f32.mrb[15].mxu0  ;;  %v4208_v29 = vld [vmem:[%s5259_s1 + $0x18] sm:$0xff]  }
 0x1d1   : > { %v566_v33 = vpack.c.bf16 %v540_v32, %v537_v27 }
 0x1d4   : > { %3699 = vmatmul.mubr.msk.bf16.gmra.mrb[32].mxu1 %vm817_vm0, %v4710_v2  ;;  %3284 = vmatmul.mubr.msk.bf16.gmra.mrb[20].mxu0 %vm817_vm0, %v561_v16  ;;  %v4108_v2 = vld [vmem:[%s5260_s2 + $0x7c] ss:$12 sps:$4 sm:$0xff]  }
 0x1d5   : > { %3702 = vmatprep.mubr.msk.bf16.mxu1 %vm817_vm0, %v783_v53  ;;  %1160 = vmatprep.mubr.bf16.mxu0 %v4311_v25 }
 0x1d6   : > { %1593 = vmatprep.subr.bf16.mxu0 %v4108_v2  ;;  %v4116_v2 = vld [vmem:[%s5260_s2 + $0xb0] ss:$12 sps:$4 sm:$0xff]  }
 0x1d7   : > { %1594 = vmatpush1.bf16.msra.mxu0 %v4106_v50  ;;  %v4117_v50 = vld [vmem:[#allocation2 + $0x40] sm:$0xff]  }
 0x1d8   : > { %2122 = vmatprep.subr.bf16.mxu0 %v4111_v9  ;;  %v4119_v9 = vld [vmem:[#allocation2 + $0x80] sm:$0xff]  }
 0x1dc   : > { %3703 = vmatmul.mubr.msk.bf16.gmra.mrb[36].mxu1 %vm817_vm0, %v4718_v5  ;;  %3285 = vmatmul.mubr.msk.bf16.gmra.mrb[24].mxu0 %vm817_vm0, %v562_v18 }
 0x1dd   : > { %3710 = vmatprep.mubr.msk.bf16.mxu1 %vm817_vm0, %v560_v56  ;;  %1170 = vmatprep.mubr.bf16.mxu0 %v4311_v25 }
 0x1e4   : > { %3286 = vmatmul.mubr.msk.bf16.gmra.mrb[28].mxu0 %vm817_vm0, %v563_v58  ;;  %3711 = vmatmul.mubr.msk.bf16.vlgmr.msra.gmra.mrb[24].mxu1 %vm817_vm0, %v561_v16 }
 0x1e5   : > { %3727 = vmatpush3.bf16.msra.mxu1 %v4467_v7  ;;  %3714 = vmatprep.mubr.msk.bf16.mxu1 %vm817_vm0, %v562_v18  ;;  %v1329_v7 = vpop.permute.xlu1 %1328  ;;  %v4206_v18 = vld [vmem:[%s5259_s1 + $0x8] sm:$0xff]  }
 0x1e6   : > { %3728 = vmatprep.subr.bf16.mxu1 %v4472_v8  ;;  %1180 = vmatprep.mubr.bf16.mxu0 %v4311_v25  ;;  %vm1369_vm5 = vcmp.eq.s32.totalorder %v1329_v7, %v4616_v31 }
 0x1e7   : > { %vm3317_vm8 = vmpackc.low %vm1369_vm5, %vm1368_vm4 }
 0x1e9   : > { %3729 = vmatpush3.bf16.msra.mxu1 %v4472_v8  ;;  %v1335_v8 = vpop.permute.xlu1 %1334 }
 0x1ea   : > { %3730 = vmatprep.subr.bf16.mxu1 %v4490_v11  ;;  %vm1371_vm6 = vcmp.eq.s32.totalorder %v1335_v8, %v4616_v31 }
 0x1ec   : > { %3287 = vmatmul.mubr.msk.bf16.gmra.mrb[32].mxu0 %vm817_vm0, %v564_v0  ;;  %3715 = vmatmul.mubr.msk.bf16.gmra.mrb[28].mxu1 %vm817_vm0, %v563_v58  ;;  %v4112_v58 = vld [vmem:[%s5260_s2 + $0xa8] ss:$12 sps:$4 sm:$0xff]  }
 0x1ed   : > { %3731 = vmatpush3.bf16.msra.mxu1 %v4490_v11  ;;  %3718 = vmatprep.mubr.msk.bf16.mxu1 %vm817_vm0, %v564_v0  ;;  %v1332_v11 = vpop.permute.xlu0 %1331 }
 0x1ee   : > { %3732 = vmatprep.subr.bf16.mxu1 %v4504_v14  ;;  %1190 = vmatprep.mubr.bf16.mxu0 %v4311_v25  ;;  %vm1370_vm7 = vcmp.eq.s32.totalorder %v1332_v11, %v4616_v31 }
 0x1ef   : > { %vm3319_vm9 = vmpackc.low %vm1371_vm6, %vm1370_vm7 }
 0x1f1   : > { %3733 = vmatpush3.bf16.msra.mxu1 %v4504_v14  ;;  %v1341_v14 = vpop.permute.xlu1 %1340 }
 0x1f2   : > { %3734 = vmatprep.subr.bf16.mxu1 %v4521_v17  ;;  %vm1373_vm10 = vcmp.eq.s32.totalorder %v1341_v14, %v4616_v31 }
 0x1f4   : > { %3288 = vmatmul.mubr.msk.bf16.gmra.mrb[36].mxu0 %vm817_vm0, %v565_v62  ;;  %3719 = vmatmul.mubr.msk.bf16.gmra.mrb[32].mxu1 %vm817_vm0, %v565_v62 }
 0x1f5   : > { %3735 = vmatpush3.bf16.msra.mxu1 %v4521_v17  ;;  %3722 = vmatprep.mubr.msk.bf16.mxu1 %vm817_vm0, %v566_v33  ;;  %v1338_v17 = vpop.permute.xlu0 %1337  ;;  %v1347_v38 = vpop.permute.xlu1 %1346 }
 0x1f6   : > { %3736 = vmatprep.subr.bf16.mxu1 %v4538_v20  ;;  %1200 = vmatprep.mubr.bf16.mxu0 %v4311_v25  ;;  %vm1372_vm11 = vcmp.eq.s32.totalorder %v1338_v17, %v4616_v31  ;;  %vm1375_vm12 = vcmp.eq.s32.totalorder %v1347_v38, %v4616_v31 }
 0x1f7   : > { %vm3321_vm14 = vmpackc.low %vm1373_vm10, %vm1372_vm11 }
 0x1f9   : > { %3737 = vmatpush3.bf16.msra.mxu1 %v4538_v20  ;;  %v1344_v39 = vpop.permute.xlu0 %1343  ;;  %v1353_v40 = vpop.permute.xlu1 %1352 }
 0x1fa   : > { %3738 = vmatprep.subr.bf16.mxu1 %v4555_v23  ;;  %vm1374_vm13 = vcmp.eq.s32.totalorder %v1344_v39, %v4616_v31  ;;  %vm1377_vm1 = vcmp.eq.s32.totalorder %v1353_v40, %v4616_v31 }
 0x1fb   : > { %vm3323_vm15 = vmpackc.low %vm1375_vm12, %vm1374_vm13 }
 0x1fc   : > { %3289 = vmatmul.mubr.msk.bf16.gmra.mrb[40].mxu0 %vm817_vm0, %v566_v33  ;;  %3723 = vmatmul.mubr.msk.bf16.gmra.mrb[36].mxu1 %vm817_vm0, %v567_v30 }
 0x1fd   : > { %3739 = vmatpush3.bf16.msra.mxu1 %v4555_v23  ;;  %3742 = vmatprep.mubr.msk.bf16.mxu1 %vm3315_vm3, %v4313_v34  ;;  %v1350_v41 = vpop.permute.xlu0 %1349  ;;  %v1359_v42 = vpop.permute.xlu1 %1358 }
 0x1fe   : > { %3740 = vmatprep.subr.bf16.mxu1 %v4567_v24  ;;  %1210 = vmatprep.mubr.bf16.mxu0 %v4311_v25  ;;  %vm1376_vm2 = vcmp.eq.s32.totalorder %v1350_v41, %v4616_v31  ;;  %vm1379_vm3 = vcmp.eq.s32.totalorder %v1359_v42, %v4616_v31  ;;  %v4210_v42 = vld [vmem:[%s5259_s1 + $0x28] sm:$0xff]  }
 0x1ff   : > { %vm3325_vm5 = vmpackc.low %vm1377_vm1, %vm1376_vm2 }
 0x201   : > { %3741 = vmatpush3.bf16.msra.mxu1 %v4567_v24  ;;  %v1356_v43 = vpop.permute.xlu0 %1355  ;;  %v1365_v48 = vpop.permute.xlu1 %1364 }
 0x202   : > { %vm1378_vm4 = vcmp.eq.s32.totalorder %v1356_v43, %v4616_v31  ;;  %3758 = vmatprep.subr.bf16.mxu1 %v4101_v44  ;;  %vm1381_vm7 = vcmp.eq.s32.totalorder %v1365_v48, %v4616_v31 }
 0x203   : > { %vm3327_vm6 = vmpackc.low %vm1379_vm3, %vm1378_vm4 }
 0x204   : > { %3290 = vmatmul.mubr.msk.bf16.gmra.mrb[44].mxu0 %vm817_vm0, %v567_v30  ;;  %3743 = vmatmul.mubr.msk.bf16.vlgmr.msra.gmra.mrb[40].mxu1 %vm3317_vm8, %v4313_v34 }
 0x205   : > { %3746 = vmatprep.mubr.msk.bf16.mxu1 %vm3319_vm9, %v4313_v34  ;;  %1623 = vmatprep.mubr.bf16.mxu0 %v4311_v25  ;;  %v1362_v49 = vpop.permute.xlu0 %1361  ;;  %v1854_v62 = vpop.permute.xlu1 %1853 }
 0x206   : > { %3759 = vmatpush3.bf16.msra.mxu1 %v4101_v44  ;;  %vm1380_vm8 = vcmp.eq.s32.totalorder %v1362_v49, %v4616_v31  ;;  %vm1898_vm10 = vcmp.eq.s32.totalorder %v1854_v62, %v4616_v31  ;;  %v4115_v44 = vld [vmem:[%s5260_s2 + $0x98] ss:$12 sps:$4 sm:$0xff]   ;;  %v4124_v62 = vld [vmem:[#allocation2 + $0x10] sm:$0xff]  }
 0x207   : > { %3760 = vmatprep.subr.bf16.mxu1 %v4102_v45  ;;  %vm3329_vm9 = vmpackc.low %vm1381_vm7, %vm1380_vm8 }
 0x209   : > { %v1851_v0 = vpop.permute.xlu0 %1850  ;;  %v1857_v32 = vpop.permute.xlu1 %1856 }
 0x20a   : > { %3761 = vmatpush3.bf16.msra.mxu1 %v4102_v45  ;;  %vm1897_vm11 = vcmp.eq.s32.totalorder %v1851_v0, %v4616_v31  ;;  %vm1899_vm13 = vcmp.eq.s32.totalorder %v1857_v32, %v4616_v31  ;;  %v4128_v0 = vld [vmem:[#allocation2 + $0x98] sm:$0xff]   ;;  %v4131_v32 = vld [vmem:[#allocation2 + $0xa0] sm:$0xff]  }
 0x20b   : > { %3778 = vmatprep.subr.bf16.mxu1 %v4205_v4  ;;  %vm3369_vm12 = vmpackc.low %vm1898_vm10, %vm1897_vm11 }
 0x20c   : > { %3747 = vmatmul.mubr.msk.bf16.gmra.mrb[44].mxu1 %vm3321_vm14, %v4313_v34 }
 0x20d   : > { %3750 = vmatprep.mubr.msk.bf16.mxu1 %vm3323_vm15, %v4313_v34  ;;  %v1860_v36 = vpop.permute.xlu0 %1859  ;;  %v1863_v11 = vpop.permute.xlu1 %1862 }
 0x20e   : > { %vm1900_vm14 = vcmp.eq.s32.totalorder %v1860_v36, %v4616_v31  ;;  %vm1901_vm15 = vcmp.eq.s32.totalorder %v1863_v11, %v4616_v31 }
 0x20f   : > { %vm3371_vm2 = vmpackc.low %vm1900_vm14, %vm1899_vm13 }
 0x211   : > { %v1866_v17 = vpop.permute.xlu0 %1865 }
 0x212   : > { %vm1902_vm1 = vcmp.eq.s32.totalorder %v1866_v17, %v4616_v31 }
 0x213   : > { %vm3373_vm3 = vmpackc.low %vm1902_vm1, %vm1901_vm15 }
 0x214   : > { %3751 = vmatmul.mubr.msk.bf16.gmra.mrb[48].mxu1 %vm3325_vm5, %v4313_v34 }
 0x215   : > { %3754 = vmatprep.mubr.msk.bf16.mxu1 %vm3327_vm6, %v4313_v34  ;;  %v1872_v43 = vpop.permute.xlu0 %1871 }
 0x216   : > { %vm1904_vm5 = vcmp.eq.s32.totalorder %v1872_v43, %v4616_v31  ;;  %v4136_v43 = vld [vmem:[#allocation2 + $0x30] sm:$0xff]  }
 0x219   : > { %v1878_v45 = vpop.permute.xlu0 %1877 }
 0x21a   : > { %vm1906_vm7 = vcmp.eq.s32.totalorder %v1878_v45, %v4616_v31  ;;  %v4139_v45 = vld [vmem:[#allocation2 + $0x38] sm:$0xff]  }
 0x21c   : > { %3755 = vmatmul.mubr.msk.bf16.gmra.mrb[52].mxu1 %vm3329_vm9, %v4313_v34 }
 0x21d   : > { %v1884_v46 = vpop.permute.xlu0 %1883 }
 0x21e   : > { %vm1908_vm11 = vcmp.eq.s32.totalorder %v1884_v46, %v4616_v31 }
 0x221   : > { %v1890_v48 = vpop.permute.xlu0 %1889 }
 0x222   : > { %vm1910_vm13 = vcmp.eq.s32.totalorder %v1890_v48, %v4616_v31 }
 0x287   : > { %v4845_v51 = vpop.f32.mrb[16].mxu1 }
 0x288   : > { %v4847_v1 = vpop.f32.mrb[17].mxu1 }
 0x289   : > { %v4849_v3 = vpop.f32.mrb[18].mxu1 }
 0x28a   : > { %v4851_v6 = vpop.f32.mrb[19].mxu1 }
 0x28f   : > { %v4853_v5 = vpop.f32.mrb[20].mxu1 }
 0x290   : > { %v4855_v52 = vpop.f32.mrb[21].mxu1 }
 0x291   : > { %v4857_v53 = vpop.f32.mrb[22].mxu1 }
 0x292   : > { %v4859_v10 = vpop.f32.mrb[23].mxu1 }
 0x2d7   : > { %v3744_v12 = vpop.f32.mrb[40].mxu1 }
 0x2d8   : > { %v1456_v13 = vpop.f32.mrb[41].mxu1 }
 0x2d9   : > { %v3745_v54 = vpop.f32.mrb[42].mxu1 }
 0x2da   : > { %v1528_v16 = vpack.c.bf16 %v3745_v54, %v3744_v12  ;;  %v1459_v55 = vpop.f32.mrb[43].mxu1 }
 0x2db   : > { %v1527_v56 = vpack.c.bf16 %v1459_v55, %v1456_v13 }
 0x2dd   : > { %3337 = vmatmul.mubr.msk.bf16.vlgmr.msra.gmra.mrb[16].mxu0 %vm817_vm0, %v1527_v56  ;;  %3762 = vmatprep.mubr.msk.bf16.mxu1 %vm817_vm0, %v1527_v56  ;;  %v4118_v56 = vld [vmem:[#allocation2] sm:$0xff]  }
 0x2de   : > { %3763 = vmatmul.mubr.msk.bf16.vlgmr.msra.gmra.mrb[24].mxu1 %vm817_vm0, %v1528_v16  ;;  %1633 = vmatprep.mubr.bf16.mxu0 %v4311_v25 }
 0x2df   : > { %3779 = vmatpush3.bf16.msra.mxu1 %v4205_v4  ;;  %v3748_v57 = vpop.f32.mrb[44].mxu1  ;;  %2123 = vmatpush1.bf16.msra.mxu0 %v4109_v15  ;;  %v1896_v4 = vpop.permute.xlu0 %1895  ;;  %v4122_v15 = vld [vmem:[#allocation2 + $0x88] sm:$0xff]  }
 0x2e0   : > { %v1472_v59 = vpop.f32.mrb[45].mxu1  ;;  %3780 = vmatprep.subr.bf16.mxu1 %v4206_v18  ;;  %2124 = vmatprep.subr.bf16.mxu0 %v4114_v19 }
 0x2e1   : > { %v3749_v22 = vpop.f32.mrb[46].mxu1 }
 0x2e2   : > { %v1530_v60 = vpack.c.bf16 %v3749_v22, %v3748_v57  ;;  %v1475_v21 = vpop.f32.mrb[47].mxu1  ;;  %v4121_v57 = vld [vmem:[#allocation2 + $0x8] sm:$0xff]  }
 0x2e3   : > { %v1529_v61 = vpack.c.bf16 %v1475_v21, %v1472_v59  ;;  %3781 = vmatpush3.bf16.msra.mxu1 %v4206_v18  ;;  %2125 = vmatpush1.bf16.msra.mxu0 %v4112_v58  ;;  %v4123_v59 = vld [vmem:[#allocation2 + $0x50] sm:$0xff]  }
 0x2e4   : > { %3782 = vmatprep.subr.bf16.mxu1 %v4207_v63  ;;  %3830 = vmatprep.subr.bf16.mxu0 %v4119_v9  ;;  %v4125_v18 = vld [vmem:[#allocation2 + $0x90] sm:$0xff]  }
 0x2e5   : > { %3338 = vmatmul.mubr.msk.bf16.gmra.mrb[20].mxu0 %vm817_vm0, %v1528_v16  ;;  %3766 = vmatprep.mubr.msk.bf16.mxu1 %vm817_vm0, %v1529_v61 }
 0x2e6   : > { %3767 = vmatmul.mubr.msk.bf16.gmra.mrb[28].mxu1 %vm817_vm0, %v1530_v60  ;;  %1643 = vmatprep.mubr.bf16.mxu0 %v4311_v25 }
 0x2e7   : > { %3783 = vmatpush3.bf16.msra.mxu1 %v4207_v63  ;;  %v3752_v26 = vpop.f32.mrb[48].mxu1  ;;  %v4126_v63 = vld [vmem:[#allocation2 + $0x58] sm:$0xff]  }
 0x2e8   : > { %v1488_v27 = vpop.f32.mrb[49].mxu1  ;;  %3784 = vmatprep.subr.bf16.mxu1 %v4208_v29 }
 0x2e9   : > { %v3753_v30 = vpop.f32.mrb[50].mxu1 }
 0x2ea   : > { %v1532_v33 = vpack.c.bf16 %v3753_v30, %v3752_v26  ;;  %v1491_v35 = vpop.f32.mrb[51].mxu1  ;;  %v4129_v30 = vld [vmem:[#allocation2 + $0x60] sm:$0xff]  }
 0x2eb   : > { %v1531_v7 = vpack.c.bf16 %v1491_v35, %v1488_v27  ;;  %3785 = vmatpush3.bf16.msra.mxu1 %v4208_v29  ;;  %v4127_v27 = vld [vmem:[#allocation2 + $0x18] sm:$0xff]  }
 0x2ec   : > { %3786 = vmatprep.subr.bf16.mxu1 %v4209_v37 }
 0x2ed   : > { %3339 = vmatmul.mubr.msk.bf16.gmra.mrb[24].mxu0 %vm817_vm0, %v1529_v61  ;;  %3770 = vmatprep.mubr.msk.bf16.mxu1 %vm817_vm0, %v1531_v7 }
 0x2ee   : > { %3771 = vmatmul.mubr.msk.bf16.gmra.mrb[32].mxu1 %vm817_vm0, %v1532_v33  ;;  %1653 = vmatprep.mubr.bf16.mxu0 %v4311_v25 }
 0x2ef   : > { %3787 = vmatpush3.bf16.msra.mxu1 %v4209_v37  ;;  %v3756_v8 = vpop.f32.mrb[52].mxu1  ;;  %v4130_v37 = vld [vmem:[#allocation2 + $0x20] sm:$0xff]  }
 0x2f0   : > { %v1504_v14 = vpop.f32.mrb[53].mxu1  ;;  %3788 = vmatprep.subr.bf16.mxu1 %v4538_v20  ;;  %v1869_v20 = vpop.permute.xlu1 %1868 }
 0x2f1   : > { %v3757_v38 = vpop.f32.mrb[54].mxu1  ;;  %vm1903_vm4 = vcmp.eq.s32.totalorder %v1869_v20, %v4616_v31  ;;  %v4135_v20 = vld [vmem:[#allocation2 + $0x70] sm:$0xff]  }
 0x2f2   : > { %v1534_v39 = vpack.c.bf16 %v3757_v38, %v3756_v8  ;;  %v1507_v40 = vpop.f32.mrb[55].mxu1  ;;  %vm3375_vm8 = vmpackc.low %vm1904_vm5, %vm1903_vm4  ;;  %v4132_v8 = vld [vmem:[#allocation2 + $0x68] sm:$0xff]  }
 0x2f3   : > { %v1533_v41 = vpack.c.bf16 %v1507_v40, %v1504_v14  ;;  %3789 = vmatpush3.bf16.msra.mxu1 %v4210_v42  ;;  %v4134_v42 = vld [vmem:[#allocation2 + $0xa8] sm:$0xff]  }
 0x2f4   : > { %3790 = vmatprep.subr.bf16.mxu1 %v4555_v23 }
 0x2f5   : > { %3340 = vmatmul.mubr.msk.bf16.gmra.mrb[28].mxu0 %vm817_vm0, %v1530_v60  ;;  %3774 = vmatprep.mubr.msk.bf16.mxu1 %vm817_vm0, %v1533_v41 }
 0x2f6   : > { %3775 = vmatmul.mubr.msk.bf16.gmra.mrb[36].mxu1 %vm817_vm0, %v1534_v39  ;;  %1663 = vmatprep.mubr.bf16.mxu0 %v4311_v25 }
 0x2f7   : > { %3791 = vmatpush3.bf16.msra.mxu1 %v4555_v23  ;;  %3794 = vmatprep.mubr.msk.bf16.mxu1 %vm3369_vm12, %v4313_v34  ;;  %v1875_v23 = vpop.permute.xlu1 %1874 }
 0x2f8   : > { %3792 = vmatprep.subr.bf16.mxu1 %v4567_v24  ;;  %vm1905_vm6 = vcmp.eq.s32.totalorder %v1875_v23, %v4616_v31  ;;  %v4138_v23 = vld [vmem:[#allocation2 + $0x78] sm:$0xff]  }
 0x2f9   : > { %vm3377_vm9 = vmpackc.low %vm1906_vm7, %vm1905_vm6 }
 0x2fb   : > { %3793 = vmatpush3.bf16.msra.mxu1 %v4567_v24  ;;  %v1881_v24 = vpop.permute.xlu1 %1880 }
 0x2fc   : > { %3810 = vmatprep.subr.bf16.mxu1 %v4115_v44  ;;  %vm1907_vm10 = vcmp.eq.s32.totalorder %v1881_v24, %v4616_v31  ;;  %v4140_v24 = vld [vmem:[#allocation2 + $0xb8] sm:$0xff]  }
 0x2fd   : > { %3341 = vmatmul.mubr.msk.bf16.gmra.mrb[32].mxu0 %vm817_vm0, %v1531_v7  ;;  %vm3379_vm14 = vmpackc.low %vm1908_vm11, %vm1907_vm10 }
 0x2fe   : > { %3795 = vmatmul.mubr.msk.bf16.vlgmr.msra.gmra.mrb[56].mxu1 %vm3371_vm2, %v4313_v34  ;;  %1673 = vmatprep.mubr.bf16.mxu0 %v4311_v25  ;;  %vm1912_vm2 = vcmp.eq.s32.totalorder %v1896_v4, %v4616_v31 }
 0x2ff   : > { %3798 = vmatprep.mubr.msk.bf16.mxu1 %vm3373_vm3, %v4313_v34  ;;  %3811 = vmatpush3.bf16.msra.mxu1 %v4115_v44  ;;  %v1887_v47 = vpop.permute.xlu1 %1886  ;;  %v4137_v44 = vld [vmem:[#allocation2 + $0xb0] sm:$0xff]  }
 0x300   : > { %vm1909_vm12 = vcmp.eq.s32.totalorder %v1887_v47, %v4616_v31  ;;  %3812 = vmatprep.subr.bf16.mxu1 %v4116_v2  ;;  %v2380_v47 = vld [vmem:[%s5261_s3] sm:$0x7] }
 0x301   : > { %vm3381_vm15 = vmpackc.low %vm1910_vm13, %vm1909_vm12 }
 0x303   : > { %v1893_v49 = vpop.permute.xlu1 %1892  ;;  %3813 = vmatpush3.bf16.msra.mxu1 %v4116_v2 }
 0x304   : > { %vm1911_vm1 = vcmp.eq.s32.totalorder %v1893_v49, %v4616_v31  ;;  %3542 = vmatprep.subr.bf16.mxu1 %v4117_v50 }
 0x305   : > { %3342 = vmatmul.mubr.msk.bf16.gmra.mrb[36].mxu0 %vm817_vm0, %v1532_v33  ;;  %vm3383_vm3 = vmpackc.low %vm1912_vm2, %vm1911_vm1 }
 0x306   : > { %3799 = vmatmul.mubr.msk.bf16.gmra.mrb[60].mxu1 %vm3375_vm8, %v4313_v34  ;;  %1683 = vmatprep.mubr.bf16.mxu0 %v4311_v25 }
 0x307   : > { %3802 = vmatprep.mubr.msk.bf16.mxu1 %vm3377_vm9, %v4313_v34 }
 0x30d   : > { %3343 = vmatmul.mubr.msk.bf16.gmra.mrb[40].mxu0 %vm817_vm0, %v1533_v41  ;;  %v4133_v41 = vld [vmem:[#allocation2 + $0x28] sm:$0xff]  }
 0x30e   : > { %3803 = vmatmul.mubr.msk.bf16.gmra.mrb[64].mxu1 %vm3379_vm14, %v4313_v34  ;;  %1693 = vmatprep.mubr.bf16.mxu0 %v4311_v25 }
 0x30f   : > { %3806 = vmatprep.mubr.msk.bf16.mxu1 %vm3381_vm15, %v4313_v34 }
 0x315   : > { %3344 = vmatmul.mubr.msk.bf16.gmra.mrb[44].mxu0 %vm817_vm0, %v1534_v39 }
 0x316   : > { %3807 = vmatmul.mubr.msk.bf16.gmra.mrb[68].mxu1 %vm3383_vm3, %v4313_v34  ;;  %2154 = vmatprep.mubr.bf16.mxu0 %v4311_v25  ;;  %v4120_v34 = vld [vmem:[#allocation2 + $0x48] sm:$0xff]  }
 0x3d1   : > { %v3796_v12 = vpop.f32.mrb[56].mxu1 }
 0x3d2   : > { %v1987_v13 = vpop.f32.mrb[57].mxu1 }
 0x3d3   : > { %v3797_v31 = vpop.f32.mrb[58].mxu1 }
 0x3d4   : > { %v2059_v54 = vpack.c.bf16 %v3797_v31, %v3796_v12  ;;  %v1990_v16 = vpop.f32.mrb[59].mxu1 }
 0x3d5   : > { %v2058_v55 = vpack.c.bf16 %v1990_v16, %v1987_v13 }
 0x3d7   : > { %3391 = vmatmul.mubr.msk.bf16.vlgmr.msra.gmra.mrb[16].mxu0 %vm817_vm0, %v2058_v55  ;;  %3814 = vmatprep.mubr.msk.bf16.mxu1 %vm817_vm0, %v2058_v55 }
 0x3d8   : > { %3815 = vmatmul.mubr.msk.bf16.vlgmr.msra.gmra.mrb[24].mxu1 %vm817_vm0, %v2059_v54  ;;  %2164 = vmatprep.mubr.bf16.mxu0 %v4311_v25 }
 0x3d9   : > { %v3800_v19 = vpop.f32.mrb[60].mxu1  ;;  %3543 = vmatpush3.bf16.msra.mxu1 %v4118_v56  ;;  %3831 = vmatpush3.bf16.msra.mxu0 %v4119_v9 }
 0x3da   : > { %v2003_v58 = vpop.f32.mrb[61].mxu1  ;;  %3544 = vmatprep.subr.bf16.mxu1 %v4120_v34  ;;  %3832 = vmatprep.subr.bf16.mxu0 %v4122_v15 }
 0x3db   : > { %v3801_v22 = vpop.f32.mrb[62].mxu1 }
 0x3dc   : > { %v2061_v60 = vpack.c.bf16 %v3801_v22, %v3800_v19  ;;  %v2006_v21 = vpop.f32.mrb[63].mxu1 }
 0x3dd   : > { %v2060_v61 = vpack.c.bf16 %v2006_v21, %v2003_v58  ;;  %3545 = vmatpush3.bf16.msra.mxu1 %v4121_v57  ;;  %3833 = vmatpush3.bf16.msra.mxu0 %v4122_v15 }
 0x3de   : > { %3546 = vmatprep.subr.bf16.mxu1 %v4123_v59  ;;  %3834 = vmatprep.subr.bf16.mxu0 %v4125_v18 }
 0x3df   : > { %3392 = vmatmul.mubr.msk.bf16.gmra.mrb[20].mxu0 %vm817_vm0, %v2059_v54  ;;  %3818 = vmatprep.mubr.msk.bf16.mxu1 %vm817_vm0, %v2060_v61 }
 0x3e0   : > { %3819 = vmatmul.mubr.msk.bf16.gmra.mrb[28].mxu1 %vm817_vm0, %v2061_v60  ;;  %2174 = vmatprep.mubr.bf16.mxu0 %v4311_v25 }
 0x3e1   : > { %v3804_v26 = vpop.f32.mrb[64].mxu1  ;;  %3547 = vmatpush3.bf16.msra.mxu1 %v4124_v62  ;;  %3835 = vmatpush3.bf16.msra.mxu0 %v4125_v18 }
 0x3e2   : > { %v2019_v29 = vpop.f32.mrb[65].mxu1  ;;  %3548 = vmatprep.subr.bf16.mxu1 %v4126_v63  ;;  %3836 = vmatprep.subr.bf16.mxu0 %v4128_v0 }
 0x3e3   : > { %v3805_v33 = vpop.f32.mrb[66].mxu1 }
 0x3e4   : > { %v2063_v35 = vpack.c.bf16 %v3805_v33, %v3804_v26  ;;  %v2022_v36 = vpop.f32.mrb[67].mxu1 }
 0x3e5   : > { %v2062_v7 = vpack.c.bf16 %v2022_v36, %v2019_v29  ;;  %3549 = vmatpush3.bf16.msra.mxu1 %v4127_v27  ;;  %3837 = vmatpush3.bf16.msra.mxu0 %v4128_v0 }
 0x3e6   : > { %3550 = vmatprep.subr.bf16.mxu1 %v4129_v30  ;;  %3838 = vmatprep.subr.bf16.mxu0 %v4131_v32 }
 0x3e7   : > { %3393 = vmatmul.mubr.msk.bf16.gmra.mrb[24].mxu0 %vm817_vm0, %v2060_v61  ;;  %3822 = vmatprep.mubr.msk.bf16.mxu1 %vm817_vm0, %v2062_v7 }
 0x3e8   : > { %3823 = vmatmul.mubr.msk.bf16.gmra.mrb[32].mxu1 %vm817_vm0, %v2063_v35  ;;  %2184 = vmatprep.mubr.bf16.mxu0 %v4311_v25 }
 0x3e9   : > { %v3808_v11 = vpop.f32.mrb[68].mxu1  ;;  %3551 = vmatpush3.bf16.msra.mxu1 %v4130_v37  ;;  %3839 = vmatpush3.bf16.msra.mxu0 %v4131_v32 }
 0x3ea   : > { %v2035_v14 = vpop.f32.mrb[69].mxu1  ;;  %3552 = vmatprep.subr.bf16.mxu1 %v4132_v8  ;;  %3840 = vmatprep.subr.bf16.mxu0 %v4134_v42 }
 0x3eb   : > { %v3809_v17 = vpop.f32.mrb[70].mxu1 }
 0x3ec   : > { %v2065_v38 = vpack.c.bf16 %v3809_v17, %v3808_v11  ;;  %v2038_v39 = vpop.f32.mrb[71].mxu1 }
 0x3ed   : > { %v2064_v40 = vpack.c.bf16 %v2038_v39, %v2035_v14  ;;  %3553 = vmatpush3.bf16.msra.mxu1 %v4133_v41  ;;  %3841 = vmatpush3.bf16.msra.mxu0 %v4134_v42 }
 0x3ee   : > { %3554 = vmatprep.subr.bf16.mxu1 %v4135_v20  ;;  %3842 = vmatprep.subr.bf16.mxu0 %v4137_v44 }
 0x3ef   : > { %3394 = vmatmul.mubr.msk.bf16.gmra.mrb[28].mxu0 %vm817_vm0, %v2061_v60  ;;  %3826 = vmatprep.mubr.msk.bf16.mxu1 %vm817_vm0, %v2064_v40 }
 0x3f0   : > { %3827 = vmatmul.mubr.msk.bf16.gmra.mrb[36].mxu1 %vm817_vm0, %v2065_v38  ;;  %2194 = vmatprep.mubr.bf16.mxu0 %v4311_v25 }
 0x3f1   : > { %3555 = vmatpush3.bf16.msra.mxu1 %v4136_v43  ;;  %3843 = vmatpush3.bf16.msra.mxu0 %v4137_v44 }
 0x3f2   : > { %3556 = vmatprep.subr.bf16.mxu1 %v4138_v23  ;;  %3844 = vmatprep.subr.bf16.mxu0 %v4140_v24 }
 0x3f5   : > { %3557 = vmatpush3.bf16.msra.mxu1 %v4139_v45  ;;  %3845 = vmatpush3.bf16.msra.mxu0 %v4140_v24 }
 0x3f7   : > { %3395 = vmatmul.mubr.msk.bf16.gmra.mrb[32].mxu0 %vm817_vm0, %v2062_v7 }
 0x3f8   : > { %2204 = vmatprep.mubr.bf16.mxu0 %v4311_v25 }
 0x3ff   : > { %3396 = vmatmul.mubr.msk.bf16.gmra.mrb[36].mxu0 %vm817_vm0, %v2063_v35 }
 0x400   : > { %2214 = vmatprep.mubr.bf16.mxu0 %v4311_v25 }
 0x407   : > { %3397 = vmatmul.mubr.msk.bf16.gmra.mrb[40].mxu0 %vm817_vm0, %v2064_v40 }
 0x408   : > { %2224 = vmatprep.mubr.bf16.mxu0 %v4311_v25  ;;  %v2383_v25 = vshrl.u32 %v301_v28, 7 }
 0x40a   : > { %v2384_v46 = vsub.s32 0, %v2383_v25  ;;  %v2388_v48 = vsub.s32 1, %v2383_v25  ;;  %v2392_v49 = vsub.s32 2, %v2383_v25 }
 0x40c   : > { %v4974_v4 = vrot.slane %v2380_v47, %v2384_v46  ;;  %v4976_v2 = vrot.slane %v2380_v47, %v2388_v48  ;;  %v4978_v50 = vrot.slane %v2380_v47, %v2392_v49 }
 0x40f   : > { %3398 = vmatmul.mubr.msk.bf16.gmra.mrb[44].mxu0 %vm817_vm0, %v2065_v38 }
 0x4aa   : > { %v2156_v9 = vpop.f32.mrb[16].mxu0 }
 0x4ab   : > { %v2397_v12 = vadd.f32 %v4974_v4, %v2156_v9  ;;  %v2158_v13 = vpop.f32.mrb[17].mxu0  ;;  %v3816_v31 = vpop.f32.mrb[24].mxu1 }
 0x4ac   : > { %v2398_v28 = vadd.f32 %v4976_v2, %v2158_v13  ;;  %v2405_v54 = vadd.f32 %v3816_v31, %v4978_v50  ;;  %v2160_v16 = vpop.f32.mrb[18].mxu0  ;;  %v2269_v55 = vpop.f32.mrb[25].mxu1 }
 0x4ad   : > { %v2400_v56 = vadd.f32 %v4974_v4, %v2160_v16  ;;  %v2399_v34 = vadd.f32 %v4978_v50, %v2269_v55  ;;  %v2162_v15 = vpop.f32.mrb[19].mxu0  ;;  %v3817_v19 = vpop.f32.mrb[26].mxu1  ;;  %v2445_v18 = vmax.f32 %v2397_v12, 0.0 }
 0x4ae   : > { %v2401_v57 = vadd.f32 %v4976_v2, %v2162_v15  ;;  %v2408_v58 = vadd.f32 %v3817_v19, %v4978_v50  ;;  %v2272_v59 = vpop.f32.mrb[27].mxu1  ;;  %v2446_v21 = vmax.f32 %v2398_v28, 0.0  ;;  %v2453_v61 = vmax.f32 %v2405_v54, 0.0 }
 0x4af   : > { %v2448_v22 = vmax.f32 %v2400_v56, 0.0  ;;  %v2402_v60 = vadd.f32 %v4978_v50, %v2272_v59  ;;  %v2447_v26 = vmax.f32 %v2399_v34, 0.0 }
 0x4b0   : > { %v2449_v62 = vmax.f32 %v2401_v57, 0.0  ;;  %v2456_v63 = vmax.f32 %v2408_v58, 0.0 }
 0x4b1   : > { %v2493_v0 = vpack.c.bf16 %v2448_v22, %v2445_v18  ;;  %v2450_v27 = vmax.f32 %v2402_v60, 0.0 }
 0x4b2   : > { %v2494_v29 = vpack.c.bf16 %v2449_v62, %v2446_v21  ;;  %v2498_v30 = vpack.c.bf16 %v2456_v63, %v2453_v61  ;;  %v2166_v32 = vpop.f32.mrb[20].mxu0 }
 0x4b3   : > { %v2495_v33 = vpack.c.bf16 %v2450_v27, %v2447_v26  ;;  %v2403_v35 = vadd.f32 %v4974_v4, %v2166_v32  ;;  %v2168_v36 = vpop.f32.mrb[21].mxu0  ;;  %v3820_v7 = vpop.f32.mrb[28].mxu1 }
 0x4b4   : > { %v2404_v37 = vadd.f32 %v4976_v2, %v2168_v36  ;;  %v2417_v8 = vadd.f32 %v3820_v7, %v4978_v50  ;;  %v2170_v11 = vpop.f32.mrb[22].mxu0  ;;  %v2285_v14 = vpop.f32.mrb[29].mxu1  ;;  %2748 = vmatprep.mubr.bf16.mxu1 %v2494_v29 }
 0x4b5   : > { %v2406_v17 = vadd.f32 %v4974_v4, %v2170_v11  ;;  %v2411_v38 = vadd.f32 %v4978_v50, %v2285_v14  ;;  %v2172_v39 = vpop.f32.mrb[23].mxu0  ;;  %v3821_v40 = vpop.f32.mrb[30].mxu1  ;;  %2749 = vmatmul.mubr.bf16.vlgmr.msra.gmra.mrb[72].mxu1 %v2493_v0  ;;  %3846 = vmatprep.mubr.bf16.mxu0 %v2495_v33  ;;  %v2451_v43 = vmax.f32 %v2403_v35, 0.0 }
 0x4b6   : > { %v2407_v41 = vadd.f32 %v4976_v2, %v2172_v39  ;;  %v2420_v42 = vadd.f32 %v3821_v40, %v4978_v50  ;;  %v2288_v20 = vpop.f32.mrb[31].mxu1  ;;  %3847 = vmatmul.mubr.bf16.vlgmr.msra.gmra.mrb[48].mxu0 %v2498_v30  ;;  %v2452_v45 = vmax.f32 %v2404_v37, 0.0  ;;  %v2465_v24 = vmax.f32 %v2417_v8, 0.0 }
 0x4b7   : > { %v2454_v44 = vmax.f32 %v2406_v17, 0.0  ;;  %v2414_v23 = vadd.f32 %v4978_v50, %v2288_v20  ;;  %v2459_v48 = vmax.f32 %v2411_v38, 0.0 }
 0x4b8   : > { %v2455_v25 = vmax.f32 %v2407_v41, 0.0  ;;  %v2468_v46 = vmax.f32 %v2420_v42, 0.0 }
 0x4b9   : > { %v2496_v47 = vpack.c.bf16 %v2454_v44, %v2451_v43  ;;  %v2462_v49 = vmax.f32 %v2414_v23, 0.0 }
 0x4ba   : > { %v2497_v9 = vpack.c.bf16 %v2455_v25, %v2452_v45  ;;  %v2504_v12 = vpack.c.bf16 %v2468_v46, %v2465_v24  ;;  %v2176_v13 = vpop.f32.mrb[24].mxu0 }
 0x4bb   : > { %v2501_v31 = vpack.c.bf16 %v2462_v49, %v2459_v48  ;;  %v2409_v28 = vadd.f32 %v4974_v4, %v2176_v13  ;;  %v2178_v54 = vpop.f32.mrb[25].mxu0  ;;  %v3824_v16 = vpop.f32.mrb[32].mxu1 }
 0x4bc   : > { %v2410_v55 = vadd.f32 %v4976_v2, %v2178_v54  ;;  %v2429_v56 = vadd.f32 %v3824_v16, %v4978_v50  ;;  %v2180_v34 = vpop.f32.mrb[26].mxu0  ;;  %v2301_v15 = vpop.f32.mrb[33].mxu1  ;;  %2756 = vmatprep.mubr.bf16.mxu1 %v2497_v9 }
 0x4bd   : > { %v2412_v19 = vadd.f32 %v4974_v4, %v2180_v34  ;;  %v2423_v57 = vadd.f32 %v4978_v50, %v2301_v15  ;;  %v2182_v58 = vpop.f32.mrb[27].mxu0  ;;  %v3825_v59 = vpop.f32.mrb[34].mxu1  ;;  %2757 = vmatmul.mubr.bf16.gmra.mrb[76].mxu1 %v2496_v47  ;;  %3850 = vmatprep.mubr.bf16.mxu0 %v2501_v31  ;;  %v2457_v21 = vmax.f32 %v2409_v28, 0.0 }
 0x4be   : > { %v2413_v18 = vadd.f32 %v4976_v2, %v2182_v58  ;;  %v2432_v22 = vadd.f32 %v3825_v59, %v4978_v50  ;;  %v2304_v60 = vpop.f32.mrb[35].mxu1  ;;  %3851 = vmatmul.mubr.bf16.gmra.mrb[52].mxu0 %v2504_v12  ;;  %v2458_v63 = vmax.f32 %v2410_v55, 0.0  ;;  %v2477_v0 = vmax.f32 %v2429_v56, 0.0 }
 0x4bf   : > { %v2460_v61 = vmax.f32 %v2412_v19, 0.0  ;;  %v2426_v62 = vadd.f32 %v4978_v50, %v2304_v60  ;;  %v2471_v30 = vmax.f32 %v2423_v57, 0.0 }
 0x4c0   : > { %v2461_v26 = vmax.f32 %v2413_v18, 0.0  ;;  %v2480_v27 = vmax.f32 %v2432_v22, 0.0 }
 0x4c1   : > { %v2499_v29 = vpack.c.bf16 %v2460_v61, %v2457_v21  ;;  %v2474_v32 = vmax.f32 %v2426_v62, 0.0 }
 0x4c2   : > { %v2500_v33 = vpack.c.bf16 %v2461_v26, %v2458_v63  ;;  %v2510_v35 = vpack.c.bf16 %v2480_v27, %v2477_v0  ;;  %v2186_v36 = vpop.f32.mrb[28].mxu0 }
 0x4c3   : > { %v2507_v7 = vpack.c.bf16 %v2474_v32, %v2471_v30  ;;  %v2415_v37 = vadd.f32 %v4974_v4, %v2186_v36  ;;  %v2188_v8 = vpop.f32.mrb[29].mxu0  ;;  %v3828_v11 = vpop.f32.mrb[36].mxu1 }
 0x4c4   : > { %v2416_v14 = vadd.f32 %v4976_v2, %v2188_v8  ;;  %v2441_v17 = vadd.f32 %v3828_v11, %v4978_v50  ;;  %v2190_v38 = vpop.f32.mrb[30].mxu0  ;;  %v2317_v39 = vpop.f32.mrb[37].mxu1  ;;  %2764 = vmatprep.mubr.bf16.mxu1 %v2500_v33 }
 0x4c5   : > { %v2418_v40 = vadd.f32 %v4974_v4, %v2190_v38  ;;  %v2435_v41 = vadd.f32 %v4978_v50, %v2317_v39  ;;  %v2192_v42 = vpop.f32.mrb[31].mxu0  ;;  %v3829_v20 = vpop.f32.mrb[38].mxu1  ;;  %2765 = vmatmul.mubr.bf16.gmra.mrb[80].mxu1 %v2499_v29  ;;  %3854 = vmatprep.mubr.bf16.mxu0 %v2507_v7  ;;  %v2463_v45 = vmax.f32 %v2415_v37, 0.0 }
 0x4c6   : > { %v2419_v43 = vadd.f32 %v4976_v2, %v2192_v42  ;;  %v2444_v44 = vadd.f32 %v3829_v20, %v4978_v50  ;;  %v2320_v23 = vpop.f32.mrb[39].mxu1  ;;  %3855 = vmatmul.mubr.bf16.gmra.mrb[56].mxu0 %v2510_v35  ;;  %v2464_v46 = vmax.f32 %v2416_v14, 0.0  ;;  %v2489_v47 = vmax.f32 %v2441_v17, 0.0 }
 0x4c7   : > { %v2466_v24 = vmax.f32 %v2418_v40, 0.0  ;;  %v2438_v25 = vadd.f32 %v4978_v50, %v2320_v23  ;;  %v2483_v12 = vmax.f32 %v2435_v41, 0.0 }
 0x4c8   : > { %v2467_v48 = vmax.f32 %v2419_v43, 0.0  ;;  %v2492_v49 = vmax.f32 %v2444_v44, 0.0 }
 0x4c9   : > { %v2502_v9 = vpack.c.bf16 %v2466_v24, %v2463_v45  ;;  %v2486_v13 = vmax.f32 %v2438_v25, 0.0 }
 0x4ca   : > { %v2503_v31 = vpack.c.bf16 %v2467_v48, %v2464_v46  ;;  %v2516_v28 = vpack.c.bf16 %v2492_v49, %v2489_v47  ;;  %v2196_v54 = vpop.f32.mrb[32].mxu0 }
 0x4cb   : > { %v2513_v16 = vpack.c.bf16 %v2486_v13, %v2483_v12  ;;  %v2421_v55 = vadd.f32 %v4974_v4, %v2196_v54  ;;  %v2198_v56 = vpop.f32.mrb[33].mxu0 }
 0x4cc   : > { %v2422_v34 = vadd.f32 %v4976_v2, %v2198_v56  ;;  %v2200_v15 = vpop.f32.mrb[34].mxu0  ;;  %2772 = vmatprep.mubr.bf16.mxu1 %v2503_v31 }
 0x4cd   : > { %v2424_v50 = vadd.f32 %v4974_v4, %v2200_v15  ;;  %v2202_v19 = vpop.f32.mrb[35].mxu0  ;;  %2773 = vmatmul.mubr.bf16.gmra.mrb[84].mxu1 %v2502_v9  ;;  %3858 = vmatprep.mubr.bf16.mxu0 %v2513_v16  ;;  %v2469_v58 = vmax.f32 %v2421_v55, 0.0 }
 0x4ce   : > { %v2425_v57 = vadd.f32 %v4976_v2, %v2202_v19  ;;  %3859 = vmatmul.mubr.bf16.gmra.mrb[60].mxu0 %v2516_v28  ;;  %v2470_v18 = vmax.f32 %v2422_v34, 0.0 }
 0x4cf   : > { %v2472_v59 = vmax.f32 %v2424_v50, 0.0 }
 0x4d0   : > { %v2473_v22 = vmax.f32 %v2425_v57, 0.0 }
 0x4d1   : > { %v2505_v60 = vpack.c.bf16 %v2472_v59, %v2469_v58 }
 0x4d2   : > { %v2506_v21 = vpack.c.bf16 %v2473_v22, %v2470_v18  ;;  %v2206_v61 = vpop.f32.mrb[36].mxu0 }
 0x4d3   : > { %v2427_v62 = vadd.f32 %v4974_v4, %v2206_v61  ;;  %v2208_v63 = vpop.f32.mrb[37].mxu0 }
 0x4d4   : > { %v2428_v0 = vadd.f32 %v4976_v2, %v2208_v63  ;;  %v2210_v26 = vpop.f32.mrb[38].mxu0  ;;  %2780 = vmatprep.mubr.bf16.mxu1 %v2506_v21 }
 0x4d5   : > { %v2430_v27 = vadd.f32 %v4974_v4, %v2210_v26  ;;  %v2212_v29 = vpop.f32.mrb[39].mxu0  ;;  %2781 = vmatmul.mubr.bf16.gmra.mrb[88].mxu1 %v2505_v60  ;;  %v2475_v32 = vmax.f32 %v2427_v62, 0.0 }
 0x4d6   : > { %v2431_v30 = vadd.f32 %v4976_v2, %v2212_v29  ;;  %v2476_v35 = vmax.f32 %v2428_v0, 0.0 }
 0x4d7   : > { %v2478_v33 = vmax.f32 %v2430_v27, 0.0 }
 0x4d8   : > { %v2479_v36 = vmax.f32 %v2431_v30, 0.0 }
 0x4d9   : > { %v2508_v7 = vpack.c.bf16 %v2478_v33, %v2475_v32 }
 0x4da   : > { %v2509_v37 = vpack.c.bf16 %v2479_v36, %v2476_v35  ;;  %v2216_v8 = vpop.f32.mrb[40].mxu0 }
 0x4db   : > { %v3866_v11 = vadd.f32 %v2216_v8, %v4845_v51  ;;  %v2218_v14 = vpop.f32.mrb[41].mxu0 }
 0x4dc   : > { %v3867_v17 = vadd.f32 %v2218_v14, %v4847_v1  ;;  %v2220_v38 = vpop.f32.mrb[42].mxu0  ;;  %2788 = vmatprep.mubr.bf16.mxu1 %v2509_v37 }
 0x4dd   : > { %v2433_v39 = vadd.f32 %v3866_v11, %v4974_v4  ;;  %v3868_v40 = vadd.f32 %v2220_v38, %v4849_v3  ;;  %v2222_v41 = vpop.f32.mrb[43].mxu0  ;;  %2789 = vmatmul.mubr.bf16.gmra.mrb[92].mxu1 %v2508_v7 }
 0x4de   : > { %v2434_v42 = vadd.f32 %v3867_v17, %v4976_v2  ;;  %v3869_v20 = vadd.f32 %v2222_v41, %v4851_v6 }
 0x4df   : > { %v2436_v43 = vadd.f32 %v3868_v40, %v4974_v4  ;;  %v2481_v51 = vmax.f32 %v2433_v39, 0.0 }
 0x4e0   : > { %v2437_v44 = vadd.f32 %v3869_v20, %v4976_v2  ;;  %v2482_v45 = vmax.f32 %v2434_v42, 0.0 }
 0x4e1   : > { %v2484_v23 = vmax.f32 %v2436_v43, 0.0 }
 0x4e2   : > { %v2485_v1 = vmax.f32 %v2437_v44, 0.0  ;;  %v2226_v24 = vpop.f32.mrb[44].mxu0 }
 0x4e3   : > { %v3870_v25 = vadd.f32 %v2226_v24, %v4853_v5  ;;  %v2228_v46 = vpop.f32.mrb[45].mxu0  ;;  %v2511_v47 = vpack.c.bf16 %v2484_v23, %v2481_v51 }
 0x4e4   : > { %v3871_v3 = vadd.f32 %v2228_v46, %v4855_v52  ;;  %v2230_v48 = vpop.f32.mrb[46].mxu0  ;;  %v2512_v49 = vpack.c.bf16 %v2485_v1, %v2482_v45 }
 0x4e5   : > { %v2439_v9 = vadd.f32 %v3870_v25, %v4974_v4  ;;  %v3872_v6 = vadd.f32 %v2230_v48, %v4857_v53  ;;  %v2232_v12 = vpop.f32.mrb[47].mxu0 }
 0x4e6   : > { %v2440_v13 = vadd.f32 %v3871_v3, %v4976_v2  ;;  %v3873_v31 = vadd.f32 %v2232_v12, %v4859_v10  ;;  %2796 = vmatprep.mubr.bf16.mxu1 %v2512_v49  ;;  %v5039_v10 = vld [vmem:[%s5263_s5] ss:$0 sm:$0xff] }
 0x4e7   : > { %v2442_v28 = vadd.f32 %v3872_v6, %v4974_v4  ;;  %2797 = vmatmul.mubr.bf16.gmra.mrb[96].mxu1 %v2511_v47  ;;  %v2487_v54 = vmax.f32 %v2439_v9, 0.0 }
 0x4e8   : > { %v2443_v5 = vadd.f32 %v3873_v31, %v4976_v2  ;;  %v2488_v52 = vmax.f32 %v2440_v13, 0.0 }
 0x4e9   : > { %v2490_v16 = vmax.f32 %v2442_v28, 0.0 }
 0x4ea   : > { %v2491_v55 = vmax.f32 %v2443_v5, 0.0 }
 0x4eb   : > { %v2514_v56 = vpack.c.bf16 %v2490_v16, %v2487_v54 }
 0x4ec   : > { %v2515_v34 = vpack.c.bf16 %v2491_v55, %v2488_v52 }
 0x4ee   : > { %2804 = vmatprep.mubr.bf16.mxu1 %v2515_v34 }
 0x4ef   : > { %2805 = vmatmul.mubr.bf16.gmra.mrb[100].mxu1 %v2514_v56 }
 0x588   : > { %v3558_v53 = vpop.f32.mrb[72].mxu1 }
 0x589   : > { %v3559_v15 = vpop.f32.mrb[73].mxu1  ;;  %v3848_v50 = vpop.f32.mrb[48].mxu0 }
 0x58a   : > { %v3560_v4 = vadd.f32 %v3559_v15, %v3558_v53  ;;  %v3561_v19 = vpop.f32.mrb[74].mxu1  ;;  %v2847_v57 = vpop.f32.mrb[49].mxu0 }
 0x58b   : > { %v3562_v2 = vpop.f32.mrb[75].mxu1  ;;  %v3849_v58 = vpop.f32.mrb[50].mxu0 }
 0x58c   : > { %v2751_v59 = vadd.f32 %v3560_v4, %v5039_v10  ;;  %v3563_v18 = vadd.f32 %v3562_v2, %v3561_v19  ;;  %v2850_v22 = vpop.f32.mrb[51].mxu0 }
 0x58e   : > { %v5042_v60 = vadd.f32 %v2847_v57, %v2751_v59  ;;  %v2754_v21 = vadd.f32 %v3563_v18, %v5039_v10 }
 0x590   : > { %v5045_v61 = vadd.f32 %v2850_v22, %v2754_v21  ;;  %v3564_v62 = vpop.f32.mrb[76].mxu1  ;;  %2910 = vmax.xlane.f32.xlu1 %v5042_v60 }
 0x591   : > { %v3565_v63 = vpop.f32.mrb[77].mxu1  ;;  %v3852_v0 = vpop.f32.mrb[52].mxu0 }
 0x592   : > { %v3566_v26 = vadd.f32 %v3565_v63, %v3564_v62  ;;  %v3567_v27 = vpop.f32.mrb[78].mxu1  ;;  %v2863_v29 = vpop.f32.mrb[53].mxu0  ;;  %2912 = vmax.xlane.f32.xlu0 %v5045_v61 }
 0x593   : > { %v3568_v30 = vpop.f32.mrb[79].mxu1  ;;  %v3853_v32 = vpop.f32.mrb[54].mxu0 }
 0x594   : > { %v2759_v33 = vadd.f32 %v3566_v26, %v5039_v10  ;;  %v3569_v35 = vadd.f32 %v3568_v30, %v3567_v27  ;;  %v2866_v36 = vpop.f32.mrb[55].mxu0 }
 0x596   : > { %v2762_v7 = vadd.f32 %v3569_v35, %v5039_v10  ;;  %v5051_v37 = vadd.f32 %v3848_v50, %v2759_v33 }
 0x598   : > { %v3570_v8 = vpop.f32.mrb[80].mxu1  ;;  %2914 = vmax.xlane.f32.xlu0 %v5051_v37  ;;  %v5054_v11 = vadd.f32 %v3849_v58, %v2762_v7 }
 0x599   : > { %v3571_v14 = vpop.f32.mrb[81].mxu1  ;;  %v3856_v17 = vpop.f32.mrb[56].mxu0 }
 0x59a   : > { %v3572_v38 = vadd.f32 %v3571_v14, %v3570_v8  ;;  %v3573_v39 = vpop.f32.mrb[82].mxu1  ;;  %v2879_v40 = vpop.f32.mrb[57].mxu0  ;;  %2916 = vmax.xlane.f32.xlu1 %v5054_v11 }
 0x59b   : > { %v3574_v41 = vpop.f32.mrb[83].mxu1  ;;  %v3857_v42 = vpop.f32.mrb[58].mxu0 }
 0x59c   : > { %v2767_v20 = vadd.f32 %v3572_v38, %v5039_v10  ;;  %v3575_v43 = vadd.f32 %v3574_v41, %v3573_v39  ;;  %v2882_v44 = vpop.f32.mrb[59].mxu0 }
 0x59e   : > { %v2770_v51 = vadd.f32 %v3575_v43, %v5039_v10  ;;  %v5059_v23 = vadd.f32 %v2863_v29, %v2767_v20 }
 0x5a0   : > { %v3576_v45 = vpop.f32.mrb[84].mxu1  ;;  %2918 = vmax.xlane.f32.xlu0 %v5059_v23  ;;  %v5062_v1 = vadd.f32 %v2866_v36, %v2770_v51 }
 0x5a1   : > { %v3577_v24 = vpop.f32.mrb[85].mxu1  ;;  %v3860_v25 = vpop.f32.mrb[60].mxu0 }
 0x5a2   : > { %v3578_v46 = vadd.f32 %v3577_v24, %v3576_v45  ;;  %v3579_v47 = vpop.f32.mrb[86].mxu1  ;;  %v2895_v3 = vpop.f32.mrb[61].mxu0  ;;  %2920 = vmax.xlane.f32.xlu1 %v5062_v1 }
 0x5a3   : > { %v3580_v48 = vpop.f32.mrb[87].mxu1  ;;  %v3861_v49 = vpop.f32.mrb[62].mxu0 }
 0x5a4   : > { %v2775_v9 = vadd.f32 %v3578_v46, %v5039_v10  ;;  %v3581_v6 = vadd.f32 %v3580_v48, %v3579_v47  ;;  %v2898_v12 = vpop.f32.mrb[63].mxu0 }
 0x5a6   : > { %v2778_v13 = vadd.f32 %v3581_v6, %v5039_v10  ;;  %v5067_v31 = vadd.f32 %v3852_v0, %v2775_v9 }
 0x5a8   : > { %v3582_v28 = vpop.f32.mrb[88].mxu1  ;;  %2922 = vmax.xlane.f32.xlu0 %v5067_v31  ;;  %v5070_v5 = vadd.f32 %v3853_v32, %v2778_v13 }
 0x5a9   : > { %v3583_v54 = vpop.f32.mrb[89].mxu1 }
 0x5aa   : > { %v3584_v16 = vadd.f32 %v3583_v54, %v3582_v28  ;;  %v3585_v52 = vpop.f32.mrb[90].mxu1  ;;  %2924 = vmax.xlane.f32.xlu1 %v5070_v5 }
 0x5ab   : > { %v3586_v55 = vpop.f32.mrb[91].mxu1 }
 0x5ac   : > { %v2783_v56 = vadd.f32 %v3584_v16, %v5039_v10  ;;  %v3587_v34 = vadd.f32 %v3586_v55, %v3585_v52 }
 0x5ae   : > { %v2786_v53 = vadd.f32 %v3587_v34, %v5039_v10  ;;  %v5075_v15 = vadd.f32 %v2879_v40, %v2783_v56 }
 0x5b0   : > { %v3588_v50 = vpop.f32.mrb[92].mxu1  ;;  %2926 = vmax.xlane.f32.xlu0 %v5075_v15  ;;  %v5078_v4 = vadd.f32 %v2882_v44, %v2786_v53 }
 0x5b1   : > { %v3589_v19 = vpop.f32.mrb[93].mxu1 }
 0x5b2   : > { %v3590_v57 = vadd.f32 %v3589_v19, %v3588_v50  ;;  %v3591_v2 = vpop.f32.mrb[94].mxu1  ;;  %2928 = vmax.xlane.f32.xlu1 %v5078_v4 }
 0x5b3   : > { %v3592_v58 = vpop.f32.mrb[95].mxu1 }
 0x5b4   : > { %v2791_v59 = vadd.f32 %v3590_v57, %v5039_v10  ;;  %v3593_v18 = vadd.f32 %v3592_v58, %v3591_v2 }
 0x5b6   : > { %v2794_v22 = vadd.f32 %v3593_v18, %v5039_v10  ;;  %v5083_v21 = vadd.f32 %v3856_v17, %v2791_v59 }
 0x5b8   : > { %2930 = vmax.xlane.f32.xlu0 %v5083_v21  ;;  %v5086_v62 = vadd.f32 %v3857_v42, %v2794_v22 }
 0x5ba   : > { %v3594_v63 = vpop.f32.mrb[96].mxu1  ;;  %2932 = vmax.xlane.f32.xlu1 %v5086_v62 }
 0x5bb   : > { %v3595_v0 = vpop.f32.mrb[97].mxu1 }
 0x5bc   : > { %v3596_v26 = vadd.f32 %v3595_v0, %v3594_v63  ;;  %v3597_v27 = vpop.f32.mrb[98].mxu1 }
 0x5bd   : > { %v3598_v29 = vpop.f32.mrb[99].mxu1 }
 0x5be   : > { %v2799_v30 = vadd.f32 %v3596_v26, %v5039_v10  ;;  %v3599_v32 = vadd.f32 %v3598_v29, %v3597_v27 }
 0x5c0   : > { %v2802_v33 = vadd.f32 %v3599_v32, %v5039_v10  ;;  %v5091_v35 = vadd.f32 %v2895_v3, %v2799_v30 }
 0x5c2   : > { %2934 = vmax.xlane.f32.xlu0 %v5091_v35  ;;  %v3600_v36 = vpop.f32.mrb[100].mxu1  ;;  %v5094_v7 = vadd.f32 %v2898_v12, %v2802_v33 }
 0x5c3   : > { %v3601_v8 = vpop.f32.mrb[101].mxu1 }
 0x5c4   : > { %v3602_v14 = vadd.f32 %v3601_v8, %v3600_v36  ;;  %2936 = vmax.xlane.f32.xlu1 %v5094_v7  ;;  %v3603_v17 = vpop.f32.mrb[102].mxu1 }
 0x5c5   : > { %v3604_v38 = vpop.f32.mrb[103].mxu1 }
 0x5c6   : > { %v2807_v39 = vadd.f32 %v3602_v14, %v5039_v10  ;;  %v3605_v40 = vadd.f32 %v3604_v38, %v3603_v17 }
 0x5c8   : > { %v2810_v41 = vadd.f32 %v3605_v40, %v5039_v10  ;;  %v5099_v42 = vadd.f32 %v3860_v25, %v2807_v39 }
 0x5ca   : > { %2938 = vmax.xlane.f32.xlu0 %v5099_v42  ;;  %v5102_v20 = vadd.f32 %v3861_v49, %v2810_v41 }
 0x5cc   : > { %2940 = vmax.xlane.f32.xlu1 %v5102_v20 }
 0x61d   : > { %v2911_v43 = vpop.xlane.xlu1 %2910 }
 0x61e   : > { %v5106_v44 = vsub.f32 %v5042_v60, %v2911_v43 }
 0x61f   : > { %v2913_v51 = vpop.xlane.xlu0 %2912 }
 0x620   : > { %v2958_v45 = vmul.f32 1.442695, %v5106_v44  ;;  %v5110_v24 = vsub.f32 %v5045_v61, %v2913_v51 }
 0x622   : > { %4141 = vpow2.f32 %v2958_v45  ;;  %v2960_v10 = vmul.f32 1.442695, %v5110_v24 }
 0x624   : > { %4143 = vpow2.f32 %v2960_v10 }
 0x625   : > { %v2915_v25 = vpop.xlane.xlu0 %2914 }
 0x626   : > { %v5114_v46 = vsub.f32 %v5051_v37, %v2915_v25 }
 0x627   : > { %v2917_v47 = vpop.xlane.xlu1 %2916 }
 0x628   : > { %v2962_v3 = vmul.f32 1.442695, %v5114_v46  ;;  %v5118_v60 = vsub.f32 %v5054_v11, %v2917_v47 }
 0x62a   : > { %4145 = vpow2.f32 %v2962_v3  ;;  %v2964_v48 = vmul.f32 1.442695, %v5118_v60 }
 0x62c   : > { %v4142_v49 = vpop.eup %4141  ;;  %4147 = vpow2.f32 %v2964_v48 }
 0x62d   : > { %v2919_v61 = vpop.xlane.xlu0 %2918  ;;  %2990 = vadd.xlane.f32.xlu0 %v4142_v49 }
 0x62e   : > { %v4144_v9 = vpop.eup %4143  ;;  %v5122_v6 = vsub.f32 %v5059_v23, %v2919_v61 }
 0x62f   : > { %v2921_v12 = vpop.xlane.xlu1 %2920  ;;  %2992 = vadd.xlane.f32.xlu1 %v4144_v9 }
 0x630   : > { %v2966_v37 = vmul.f32 1.442695, %v5122_v6  ;;  %v5126_v13 = vsub.f32 %v5062_v1, %v2921_v12 }
 0x632   : > { %4149 = vpow2.f32 %v2966_v37  ;;  %v2968_v11 = vmul.f32 1.442695, %v5126_v13 }
 0x634   : > { %v4146_v28 = vpop.eup %4145  ;;  %4151 = vpow2.f32 %v2968_v11 }
 0x635   : > { %v2923_v54 = vpop.xlane.xlu0 %2922  ;;  %2994 = vadd.xlane.f32.xlu0 %v4146_v28 }
 0x636   : > { %v4148_v16 = vpop.eup %4147  ;;  %v5130_v52 = vsub.f32 %v5067_v31, %v2923_v54 }
 0x637   : > { %v2925_v23 = vpop.xlane.xlu1 %2924  ;;  %2996 = vadd.xlane.f32.xlu1 %v4148_v16 }
 0x638   : > { %v2970_v55 = vmul.f32 1.442695, %v5130_v52  ;;  %v5134_v56 = vsub.f32 %v5070_v5, %v2925_v23 }
 0x63a   : > { %4153 = vpow2.f32 %v2970_v55  ;;  %v2972_v1 = vmul.f32 1.442695, %v5134_v56 }
 0x63c   : > { %v4150_v34 = vpop.eup %4149  ;;  %4155 = vpow2.f32 %v2972_v1 }
 0x63d   : > { %v2927_v53 = vpop.xlane.xlu0 %2926  ;;  %2998 = vadd.xlane.f32.xlu0 %v4150_v34 }
 0x63e   : > { %v4152_v50 = vpop.eup %4151  ;;  %v5138_v19 = vsub.f32 %v5075_v15, %v2927_v53 }
 0x63f   : > { %v2929_v31 = vpop.xlane.xlu1 %2928  ;;  %3000 = vadd.xlane.f32.xlu1 %v4152_v50 }
 0x640   : > { %v2974_v57 = vmul.f32 1.442695, %v5138_v19  ;;  %v5142_v2 = vsub.f32 %v5078_v4, %v2929_v31 }
 0x642   : > { %4157 = vpow2.f32 %v2974_v57  ;;  %v2976_v5 = vmul.f32 1.442695, %v5142_v2 }
 0x644   : > { %v4154_v58 = vpop.eup %4153  ;;  %4159 = vpow2.f32 %v2976_v5 }
 0x645   : > { %v2931_v59 = vpop.xlane.xlu0 %2930  ;;  %3002 = vadd.xlane.f32.xlu0 %v4154_v58 }
 0x646   : > { %v4156_v18 = vpop.eup %4155  ;;  %v5146_v22 = vsub.f32 %v5083_v21, %v2931_v59 }
 0x647   : > { %v2933_v15 = vpop.xlane.xlu1 %2932  ;;  %3004 = vadd.xlane.f32.xlu1 %v4156_v18 }
 0x648   : > { %v2978_v63 = vmul.f32 1.442695, %v5146_v22  ;;  %v5150_v0 = vsub.f32 %v5086_v62, %v2933_v15 }
 0x64a   : > { %4161 = vpow2.f32 %v2978_v63  ;;  %v2980_v4 = vmul.f32 1.442695, %v5150_v0 }
 0x64c   : > { %v4158_v26 = vpop.eup %4157  ;;  %4163 = vpow2.f32 %v2980_v4 }
 0x64d   : > { %3006 = vadd.xlane.f32.xlu0 %v4158_v26 }
 0x64e   : > { %v4160_v27 = vpop.eup %4159 }
 0x64f   : > { %v2935_v29 = vpop.xlane.xlu0 %2934  ;;  %3008 = vadd.xlane.f32.xlu1 %v4160_v27 }
 0x650   : > { %v5154_v30 = vsub.f32 %v5091_v35, %v2935_v29 }
 0x651   : > { %v2937_v21 = vpop.xlane.xlu1 %2936 }
 0x652   : > { %v2982_v32 = vmul.f32 1.442695, %v5154_v30  ;;  %v5158_v33 = vsub.f32 %v5094_v7, %v2937_v21 }
 0x654   : > { %v4162_v62 = vpop.eup %4161  ;;  %4165 = vpow2.f32 %v2982_v32  ;;  %v2984_v36 = vmul.f32 1.442695, %v5158_v33 }
 0x655   : > { %3010 = vadd.xlane.f32.xlu0 %v4162_v62 }
 0x656   : > { %v4164_v8 = vpop.eup %4163  ;;  %4167 = vpow2.f32 %v2984_v36 }
 0x657   : > { %3012 = vadd.xlane.f32.xlu1 %v4164_v8  ;;  %v2939_v14 = vpop.xlane.xlu0 %2938 }
 0x658   : > { %v5162_v17 = vsub.f32 %v5099_v42, %v2939_v14 }
 0x659   : > { %v2941_v35 = vpop.xlane.xlu1 %2940 }
 0x65a   : > { %v2986_v38 = vmul.f32 1.442695, %v5162_v17  ;;  %v5166_v39 = vsub.f32 %v5102_v20, %v2941_v35 }
 0x65c   : > { %4169 = vpow2.f32 %v2986_v38  ;;  %v2988_v7 = vmul.f32 1.442695, %v5166_v39 }
 0x65e   : > { %v4166_v40 = vpop.eup %4165  ;;  %4171 = vpow2.f32 %v2988_v7 }
 0x65f   : > { %3014 = vadd.xlane.f32.xlu0 %v4166_v40 }
 0x660   : > { %v4168_v41 = vpop.eup %4167 }
 0x661   : > { %3016 = vadd.xlane.f32.xlu1 %v4168_v41 }
 0x666   : > { %v4170_v43 = vpop.eup %4169 }
 0x667   : > { %3018 = vadd.xlane.f32.xlu0 %v4170_v43 }
 0x668   : > { %v4172_v42 = vpop.eup %4171 }
 0x669   : > { %3020 = vadd.xlane.f32.xlu1 %v4172_v42 }
 0x6ba   : > { %v2991_v51 = vpop.xlane.xlu0 %2990 }
 0x6bb   : > { %4173 = vlog2.f32 %v2991_v51 }
 0x6bc   : > { %v2993_v45 = vpop.xlane.xlu1 %2992 }
 0x6bd   : > { %4175 = vlog2.f32 %v2993_v45 }
 0x6c2   : > { %v2995_v20 = vpop.xlane.xlu0 %2994 }
 0x6c3   : > { %4177 = vlog2.f32 %v2995_v20 }
 0x6c4   : > { %v2997_v10 = vpop.xlane.xlu1 %2996 }
 0x6c5   : > { %v4174_v25 = vpop.eup %4173  ;;  %4179 = vlog2.f32 %v2997_v10 }
 0x6c6   : > { %v3023_v47 = vmul.f32 0.6931472, %v4174_v25 }
 0x6c7   : > { %v4176_v3 = vpop.eup %4175 }
 0x6c8   : > { %v3054_v48 = vsub.f32 %v5106_v44, %v3023_v47  ;;  %v3025_v49 = vmul.f32 0.6931472, %v4176_v3 }
 0x6ca   : > { %3070 = vst [vmem:[%s5173_s28] sm:$0xff] %v3054_v48  ;;  %v3055_v61 = vsub.f32 %v5110_v24, %v3025_v49  ;;  %v2999_v9 = vpop.xlane.xlu0 %2998 }
 0x6cb   : > { %4181 = vlog2.f32 %v2999_v9 }
 0x6cc   : > { %3071 = vst [vmem:[%s5173_s28 + $0x8] sm:$0xff] %v3055_v61  ;;  %v3001_v12 = vpop.xlane.xlu1 %3000 }
 0x6cd   : > { %v4178_v37 = vpop.eup %4177  ;;  %4183 = vlog2.f32 %v3001_v12 }
 0x6ce   : > { %v3027_v11 = vmul.f32 0.6931472, %v4178_v37 }
 0x6cf   : > { %v4180_v28 = vpop.eup %4179 }
 0x6d0   : > { %v3056_v44 = vsub.f32 %v5114_v46, %v3027_v11  ;;  %v3029_v54 = vmul.f32 0.6931472, %v4180_v28 }
 0x6d2   : > { %3072 = vst [vmem:[%s5173_s28 + $0x10] sm:$0xff] %v3056_v44  ;;  %v3057_v16 = vsub.f32 %v5118_v60, %v3029_v54  ;;  %v3003_v23 = vpop.xlane.xlu0 %3002 }
 0x6d3   : > { %4185 = vlog2.f32 %v3003_v23 }
 0x6d4   : > { %3073 = vst [vmem:[%s5173_s28 + $0x18] sm:$0xff] %v3057_v16  ;;  %v3005_v24 = vpop.xlane.xlu1 %3004 }
 0x6d5   : > { %v4182_v55 = vpop.eup %4181  ;;  %4187 = vlog2.f32 %v3005_v24 }
 0x6d6   : > { %v3031_v1 = vmul.f32 0.6931472, %v4182_v55 }
 0x6d7   : > { %v4184_v34 = vpop.eup %4183 }
 0x6d8   : > { %v3058_v53 = vsub.f32 %v5122_v6, %v3031_v1  ;;  %v3033_v50 = vmul.f32 0.6931472, %v4184_v34 }
 0x6da   : > { %3074 = vst [vmem:[%s5173_s28 + $0x20] sm:$0xff] %v3058_v53  ;;  %v3059_v46 = vsub.f32 %v5126_v13, %v3033_v50  ;;  %v3007_v31 = vpop.xlane.xlu0 %3006 }
 0x6db   : > { %4189 = vlog2.f32 %v3007_v31 }
 0x6dc   : > { %3075 = vst [vmem:[%s5173_s28 + $0x28] sm:$0xff] %v3059_v46  ;;  %v3009_v60 = vpop.xlane.xlu1 %3008 }
 0x6dd   : > { %v4186_v57 = vpop.eup %4185  ;;  %4191 = vlog2.f32 %v3009_v60 }
 0x6de   : > { %v3035_v5 = vmul.f32 0.6931472, %v4186_v57 }
 0x6df   : > { %v4188_v58 = vpop.eup %4187 }
 0x6e0   : > { %v3060_v59 = vsub.f32 %v5130_v52, %v3035_v5  ;;  %v3037_v18 = vmul.f32 0.6931472, %v4188_v58 }
 0x6e2   : > { %3076 = vst [vmem:[%s5173_s28 + $0x30] sm:$0xff] %v3060_v59  ;;  %v3061_v6 = vsub.f32 %v5134_v56, %v3037_v18  ;;  %v3011_v15 = vpop.xlane.xlu0 %3010 }
 0x6e3   : > { %4193 = vlog2.f32 %v3011_v15 }
 0x6e4   : > { %3077 = vst [vmem:[%s5173_s28 + $0x38] sm:$0xff] %v3061_v6  ;;  %v3013_v13 = vpop.xlane.xlu1 %3012 }
 0x6e5   : > { %v4190_v63 = vpop.eup %4189  ;;  %4195 = vlog2.f32 %v3013_v13 }
 0x6e6   : > { %v3039_v4 = vmul.f32 0.6931472, %v4190_v63 }
 0x6e7   : > { %v4192_v26 = vpop.eup %4191 }
 0x6e8   : > { %v3062_v27 = vsub.f32 %v5138_v19, %v3039_v4  ;;  %v3041_v29 = vmul.f32 0.6931472, %v4192_v26 }
 0x6ea   : > { %3078 = vst [vmem:[%s5173_s28 + $0x40] sm:$0xff] %v3062_v27  ;;  %v3063_v52 = vsub.f32 %v5142_v2, %v3041_v29 }
 0x6ec   : > { %3079 = vst [vmem:[%s5173_s28 + $0x48] sm:$0xff] %v3063_v52  ;;  %v3015_v21 = vpop.xlane.xlu0 %3014 }
 0x6ed   : > { %v4194_v32 = vpop.eup %4193  ;;  %4197 = vlog2.f32 %v3015_v21 }
 0x6ee   : > { %v3043_v56 = vmul.f32 0.6931472, %v4194_v32  ;;  %v3017_v62 = vpop.xlane.xlu1 %3016 }
 0x6ef   : > { %v4196_v36 = vpop.eup %4195  ;;  %4199 = vlog2.f32 %v3017_v62 }
 0x6f0   : > { %v3064_v8 = vsub.f32 %v5146_v22, %v3043_v56  ;;  %v3045_v14 = vmul.f32 0.6931472, %v4196_v36 }
 0x6f2   : > { %3080 = vst [vmem:[%s5173_s28 + $0x50] sm:$0xff] %v3064_v8  ;;  %v3065_v19 = vsub.f32 %v5150_v0, %v3045_v14 }
 0x6f4   : > { %3081 = vst [vmem:[%s5173_s28 + $0x58] sm:$0xff] %v3065_v19  ;;  %v3019_v2 = vpop.xlane.xlu0 %3018 }
 0x6f5   : > { %4201 = vlog2.f32 %v3019_v2 }
 0x6f6   : > { %v3021_v35 = vpop.xlane.xlu1 %3020 }
 0x6f7   : > { %v4198_v38 = vpop.eup %4197  ;;  %4203 = vlog2.f32 %v3021_v35 }
 0x6f8   : > { %v3047_v7 = vmul.f32 0.6931472, %v4198_v38 }
 0x6f9   : > { %v4200_v40 = vpop.eup %4199 }
 0x6fa   : > { %v3066_v41 = vsub.f32 %v5154_v30, %v3047_v7  ;;  %v3049_v22 = vmul.f32 0.6931472, %v4200_v40 }
 0x6fc   : > { %3082 = vst [vmem:[%s5173_s28 + $0x60] sm:$0xff] %v3066_v41  ;;  %v3067_v43 = vsub.f32 %v5158_v33, %v3049_v22 }
 0x6fe   : > { %3083 = vst [vmem:[%s5173_s28 + $0x68] sm:$0xff] %v3067_v43 }
 0x6ff   : > { %v4202_v0 = vpop.eup %4201 }
 0x700   : > { %v3051_v42 = vmul.f32 0.6931472, %v4202_v0 }
 0x701   : > { %v4204_v51 = vpop.eup %4203 }
 0x702   : > { %v3068_v45 = vsub.f32 %v5162_v17, %v3051_v42  ;;  %v3053_v20 = vmul.f32 0.6931472, %v4204_v51 }
 0x704   : > { %3084 = vst [vmem:[%s5173_s28 + $0x70] sm:$0xff] %v3068_v45  ;;  %v3069_v30 = vsub.f32 %v5166_v39, %v3053_v20 }
 0x706   : > { %3085 = vst [vmem:[%s5173_s28 + $0x78] sm:$0xff] %v3069_v30 }
 0x707   : > { %4252 = shalt.err (!%p4249_p7)
}
 0x708   : > { %s4253_s17 = scalar_lea.hbm %s5208_s14, 2048  ;;  %s4257_s20 = scalar_lea.hbm %s5264_s6, 4096 }
 0x709   : > { %p4254_p8 = scmp.ne.s32.totalorder %s5208_s14, %s4253_s17  ;;  %p4258_p1 = scmp.lt.u32.totalorder %s5208_s14, %s5264_s6 }
 0x70a   : > { %p4259_p0 = scmp.lt.u32.totalorder %s4257_s20, %s4253_s17  ;;  %p4261_p6 = scmp.lt.u32.totalorder %s4253_s17, %s5208_s14 }
 0x70b   : > { %p4255_p11 = pnand %p4254_p8, %p5275_p9 }
 0x70c   : > { %p4260_p5 = por %p4259_p0, %p4258_p1 }
 0x70d   : > { %p4256_p13 = pneg %p4255_p11 }
 0x70e   : > { %p4262_p10 = por %p4261_p6, %p4260_p5 }
 0x710   : > { %p4263_p12 = pnand %p4262_p10, %p4256_p13 }
 0x712   : > { %4266 = shalt.err (!%p4263_p12)
}
 0x713   : > { %s4316_s29 = smov 128   ;;  %s4317_s13 = smov 8  }
 0x714   : > { %4014 = dma.vmem_to_hbm [thread:$0]  (%p5275_p9), %s5210_s10, 2048, %s5208_s14, %s5217_s25, %s4316_s29, %s4316_s29, %s4317_s13  }
 0x715 PF: > { %p4026_p2 = scmp.ge.s32.totalorder %s4305_s24, 2  ;;  %s3115_s12 = sand.u32 1, %s4293_s21  }
 0x716   : > { %p5276_p3 = scmp.ne.s32.totalorder %s5269_s8, 0  ;;  %s3116_s15 = scalar_lea.sflag [#allocation4], %s3115_s12 }
 0x718   : > { %p4021_p4 = pnand %p4026_p2, %p5276_p3 }
 0x71a   : > { %4288 = dma.done.wait (!%p4021_p4), %s3116_s15, 2048  }
 0x71b   : > { %4290 = vsyncadd (!%p4021_p4), %s3116_s15, 4294965248  ;;  %p17_p7 = scmp.ge.s32.totalorder %s4378_s27, 4   ;;  %s5277_s21 = smov %s4297_s22 }
 0x71c   : > { %s5278_s22 = smov %s4301_s23  ;;  %s5279_s23 = smov %s4389_s30 }
 0x71d   : > { %s5280_s24 = smov %s4378_s27  ;;  %19 = sbr.rel (!%p17_p7) target bundleno = 4 (0x4), region = 84 }
 0x724   :  { %3121 = vsyncpa [#allocation3], 1 }
 0x725   :  { %3123 = vsyncpa [#allocation3 + $0x1], 1 }
 0x726   :  { %3124 = vsyncpa [#allocation4], 1 }
 0x727   :  { %3126 = vsyncpa [#allocation4 + $0x1], 1 }

</bundles_post_ra>
